<compile_context>
chip_gen: v6e
topology: v6e:2x2x1
jax: 0.10.0
libtpu: 0.0.40
codegen_flags: <defaults>
</compile_context>

<pallas_src>
import jax
import jax.numpy as jnp
from jax.experimental import pallas as pl
from jax.experimental.pallas import tpu as pltpu


def make_lstm_kernel(seq: int, batch: int, hidden_size: int, temp: float):
    H = hidden_size
    B = batch
    inv_temp = 1.0 / float(temp)

    def kernel(x_ref, th_ref,
               w_in_x_ref, w_in_t_ref, b_in_ref,
               w_ih_ref, b_lstm_ref,
               w_hh_i_ref, w_hh_f_ref, w_hh_g_ref, w_hh_o_ref,
               w_out_ref, b_out_ref,
               out_ref, hN_ref, cN_ref,
               hs_sc):
        # ---------- hoisted, non-recurrent (whole sequence at once) ----------
        # thalamus_activation_function_softmax (no_of_latents == 1)
        th = th_ref[...] * inv_temp
        th = th - jnp.max(th, axis=-1, keepdims=True)
        e = jnp.exp(th)
        sm = e / jnp.sum(e, axis=-1, keepdims=True)

        # linear_in on cat([x, sm], dim=-1), split into two matmuls
        z = (jnp.dot(x_ref[...], w_in_x_ref[...],
                     preferred_element_type=jnp.float32)
             + jnp.dot(sm, w_in_t_ref[...],
                       preferred_element_type=jnp.float32)
             + b_in_ref[...])                                   # (S*B, H)

        # input-side LSTM gate pre-activations for ALL timesteps
        gates_x = (jnp.dot(z, w_ih_ref[...],
                           preferred_element_type=jnp.float32)
                   + b_lstm_ref[...])                           # (S*B, 4H)
        # split per gate ONCE (PyTorch gate order i, f, g, o), off the
        # recurrent critical path
        gx_i = gates_x[:, 0 * H:1 * H]
        gx_f = gates_x[:, 1 * H:2 * H]
        gx_g = gates_x[:, 2 * H:3 * H]
        gx_o = gates_x[:, 3 * H:4 * H]

        w_hh_i = w_hh_i_ref[...]
        w_hh_f = w_hh_f_ref[...]
        w_hh_g = w_hh_g_ref[...]
        w_hh_o = w_hh_o_ref[...]

        # ---------- serial recurrence, fully unrolled (seq static) -----------
        h = jnp.zeros((B, H), jnp.float32)   # init_hidden(): zeros
        c = jnp.zeros((B, H), jnp.float32)
        for t in range(seq):
            r0 = t * B
            gi = gx_i[r0:r0 + B, :] + jnp.dot(
                h, w_hh_i, preferred_element_type=jnp.float32)
            gf = gx_f[r0:r0 + B, :] + jnp.dot(
                h, w_hh_f, preferred_element_type=jnp.float32)
            gg = gx_g[r0:r0 + B, :] + jnp.dot(
                h, w_hh_g, preferred_element_type=jnp.float32)
            go = gx_o[r0:r0 + B, :] + jnp.dot(
                h, w_hh_o, preferred_element_type=jnp.float32)
            c = jax.nn.sigmoid(gf) * c + jax.nn.sigmoid(gi) * jnp.tanh(gg)
            h = jax.nn.sigmoid(go) * jnp.tanh(c)
            hs_sc[pl.ds(r0, B), :] = h

        # ---------- hoisted output projection, single slab store -------------
        out_ref[...] = (jnp.dot(hs_sc[...], w_out_ref[...],
                                preferred_element_type=jnp.float32)
                        + b_out_ref[...])                       # (S*B, out)
        hN_ref[...] = h
        cN_ref[...] = c

    return kernel


def lstm_model_forward(x_raw, thalamus, params, *, hidden_size, temp=1.0):
    """x_raw: (seq, batch, feat_raw) f32; thalamus: (seq, batch, thal) f32."""
    seq, batch, feat_raw = x_raw.shape
    thal = thalamus.shape[-1]
    H = hidden_size
    out_size = params["W_out"].shape[0]

    # flatten (seq, batch) -> rows (layout-only; free in the wrapper)
    x2d = x_raw.reshape(seq * batch, feat_raw)
    th2d = thalamus.reshape(seq * batch, thal)

    # weight layout prep (pure transposes / slices, no compute hoisting)
    w_in_x_T = params["W_in"][:, :feat_raw].T            # (feat_raw, H)
    w_in_t_T = params["W_in"][:, feat_raw:].T            # (thal, H)
    b_in = params["b_in"].reshape(1, H)
    w_ih_T = params["W_ih"].T                            # (H, 4H)
    b_lstm = (params["b_ih"] + params["b_hh"]).reshape(1, 4 * H)
    w_hh_T = params["W_hh"].T                            # (H, 4H)
    w_hh_i = w_hh_T[:, 0 * H:1 * H]                      # (H, H) per gate
    w_hh_f = w_hh_T[:, 1 * H:2 * H]
    w_hh_g = w_hh_T[:, 2 * H:3 * H]
    w_hh_o = w_hh_T[:, 3 * H:4 * H]
    w_out_T = params["W_out"].T                          # (H, out)
    b_out = params["b_out"].reshape(1, out_size)

    out2d, hN, cN = pl.pallas_call(
        make_lstm_kernel(seq, batch, H, temp),
        out_shape=(
            jax.ShapeDtypeStruct((seq * batch, out_size), jnp.float32),
            jax.ShapeDtypeStruct((batch, H), jnp.float32),
            jax.ShapeDtypeStruct((batch, H), jnp.float32),
        ),
        scratch_shapes=[pltpu.VMEM((seq * batch, H), jnp.float32)],
    )(x2d, th2d, w_in_x_T, w_in_t_T, b_in,
      w_ih_T, b_lstm, w_hh_i, w_hh_f, w_hh_g, w_hh_o,
      w_out_T, b_out)

    out = out2d.reshape(seq, batch, out_size)
    return out, (hN[None], cN[None])


def reference_forward(x_raw, thalamus, params, *, hidden_size, temp=1.0):
    """Pure-JAX reference mirroring the PyTorch forward."""
    H = hidden_size
    seq, batch, _ = x_raw.shape
    sm = jax.nn.softmax(thalamus / temp, axis=-1)
    inp = jnp.concatenate([x_raw, sm], axis=2)
    z = inp @ params["W_in"].T + params["b_in"]

    def step(carry, zt):
        h, c = carry
        gates = zt @ params["W_ih"].T + h @ params["W_hh"].T \
            + params["b_ih"] + params["b_hh"]
        i, f, g, o = jnp.split(gates, 4, axis=-1)
        c = jax.nn.sigmoid(f) * c + jax.nn.sigmoid(i) * jnp.tanh(g)
        h = jax.nn.sigmoid(o) * jnp.tanh(c)
        return (h, c), h

    (hN, cN), hs = jax.lax.scan(
        step, (jnp.zeros((batch, H)), jnp.zeros((batch, H))), z)
    out = hs @ params["W_out"].T + params["b_out"]
    return out, (hN[None], cN[None])


if __name__ == "__main__":
    # config: seq_size=8, batch_size=4, input_size=16, no_of_contexts=4,
    # hidden_size=32, output_size=8, rnn_type='LSTM',
    # thalamus_activation_function='softmax', activation_fxn_temp=1.0,
    # no_of_latents=1, use_reward_feedback=False
    seq, batch = 8, 4
    input_size, thal_size = 16, 4
    feat_raw = input_size - thal_size          # raw feature dim before thalamus cat
    hidden_size, output_size = 32, 8
    temp = 1.0

    key = jax.random.PRNGKey(0)
    ks = jax.random.split(key, 12)

    def u(k, shape, fan_in):
        b = 1.0 / jnp.sqrt(fan_in)
        return jax.random.uniform(k, shape, jnp.float32, -b, b)

    params = {
        "W_in": u(ks[0], (hidden_size, input_size), input_size),
        "b_in": u(ks[1], (hidden_size,), input_size),
        "W_ih": u(ks[2], (4 * hidden_size, hidden_size), hidden_size),
        "W_hh": u(ks[3], (4 * hidden_size, hidden_size), hidden_size),
        "b_ih": u(ks[4], (4 * hidden_size,), hidden_size),
        "b_hh": u(ks[5], (4 * hidden_size,), hidden_size),
        "W_out": u(ks[6], (output_size, hidden_size), hidden_size),
        "b_out": u(ks[7], (output_size,), hidden_size),
    }

    x_raw = jax.random.normal(ks[8], (seq, batch, feat_raw), jnp.float32)
    # thalamus parameter: ones / thalamus_size (as registered in __init__)
    thalamus = jnp.ones((seq, batch, thal_size), jnp.float32) / thal_size

    # TODO(synk): reward-feedback branch (config.use_reward_feedback) not wired in.
    (out, (hN, cN)) = lstm_model_forward(
        x_raw, thalamus, params, hidden_size=hidden_size, temp=temp)
    out = jax.block_until_ready(out)
    hN = jax.block_until_ready(hN)
    cN = jax.block_until_ready(cN)

    out_r, (hN_r, cN_r) = reference_forward(
        x_raw, thalamus, params, hidden_size=hidden_size, temp=temp)

    assert out.shape == (seq, batch, output_size)
    assert hN.shape == (1, batch, hidden_size)
    assert jnp.allclose(out, out_r, atol=1e-4, rtol=1e-4)
    assert jnp.allclose(hN, hN_r, atol=1e-4, rtol=1e-4)
    assert jnp.allclose(cN, cN_r, atol=1e-4, rtol=1e-4)

    print("KERNEL_OK")
</pallas_src>

<mosaic_0001>
module attributes {stable_mosaic.version = 11 : i64} {
  func.func @kernel(%arg0: memref<32x12xf32, #tpu.memory_space<vmem>>, %arg1: memref<32x4xf32, #tpu.memory_space<vmem>>, %arg2: memref<12x32xf32, #tpu.memory_space<vmem>>, %arg3: memref<4x32xf32, #tpu.memory_space<vmem>>, %arg4: memref<1x32xf32, #tpu.memory_space<vmem>>, %arg5: memref<32x128xf32, #tpu.memory_space<vmem>>, %arg6: memref<1x128xf32, #tpu.memory_space<vmem>>, %arg7: memref<32x32xf32, #tpu.memory_space<vmem>>, %arg8: memref<32x32xf32, #tpu.memory_space<vmem>>, %arg9: memref<32x32xf32, #tpu.memory_space<vmem>>, %arg10: memref<32x32xf32, #tpu.memory_space<vmem>>, %arg11: memref<32x8xf32, #tpu.memory_space<vmem>>, %arg12: memref<1x8xf32, #tpu.memory_space<vmem>>, %arg13: memref<32x8xf32, #tpu.memory_space<vmem>>, %arg14: memref<4x32xf32, #tpu.memory_space<vmem>>, %arg15: memref<4x32xf32, #tpu.memory_space<vmem>>, %arg16: memref<32x32xf32, #tpu.memory_space<vmem>>) attributes {dimension_semantics = [], scalar_prefetch = 0 : i64, scratch_operands = 1 : i64, tpu.core_type = #tpu.core_type<tc>} {
    %c0 = arith.constant 0 : index
    %c0_0 = arith.constant 0 : index
    %0 = vector.load %arg1[%c0, %c0_0] : memref<32x4xf32, #tpu.memory_space<vmem>>, vector<32x4xf32>
    %cst = arith.constant 1.000000e+00 : f32
    %1 = vector.broadcast %cst : f32 to vector<32x4xf32>
    %2 = arith.mulf %0, %1 : vector<32x4xf32>
    %cst_1 = arith.constant dense<0xFF800000> : vector<32xf32>
    %3 = vector.multi_reduction <maximumf>, %2, %cst_1 [1] : vector<32x4xf32> to vector<32xf32>
    %4 = vector.shape_cast %3 : vector<32xf32> to vector<32x1xf32>
    %5 = vector.broadcast %4 : vector<32x1xf32> to vector<32x4xf32>
    %6 = arith.subf %2, %5 : vector<32x4xf32>
    %7 = math.exp %6 : vector<32x4xf32>
    %cst_2 = arith.constant dense<0.000000e+00> : vector<32xf32>
    %8 = vector.multi_reduction <add>, %7, %cst_2 [1] : vector<32x4xf32> to vector<32xf32>
    %9 = vector.shape_cast %8 : vector<32xf32> to vector<32x1xf32>
    %10 = vector.broadcast %9 : vector<32x1xf32> to vector<32x4xf32>
    %11 = arith.divf %7, %10 : vector<32x4xf32>
    %c0_3 = arith.constant 0 : index
    %c0_4 = arith.constant 0 : index
    %12 = vector.load %arg0[%c0_3, %c0_4] : memref<32x12xf32, #tpu.memory_space<vmem>>, vector<32x12xf32>
    %c0_5 = arith.constant 0 : index
    %c0_6 = arith.constant 0 : index
    %13 = vector.load %arg2[%c0_5, %c0_6] : memref<12x32xf32, #tpu.memory_space<vmem>>, vector<12x32xf32>
    %cst_7 = arith.constant dense<0.000000e+00> : vector<32x32xf32>
    %14 = tpu.matmul %12, %13, %cst_7 {dimension_numbers = #tpu.dot_dimension_numbers<[1], [0], [0], [1], [0, 0, 1, 1], [], []>} : vector<32x12xf32>, vector<12x32xf32>, vector<32x32xf32> -> vector<32x32xf32>
    %c0_8 = arith.constant 0 : index
    %c0_9 = arith.constant 0 : index
    %15 = vector.load %arg3[%c0_8, %c0_9] : memref<4x32xf32, #tpu.memory_space<vmem>>, vector<4x32xf32>
    %cst_10 = arith.constant dense<0.000000e+00> : vector<32x32xf32>
    %16 = tpu.matmul %11, %15, %cst_10 {dimension_numbers = #tpu.dot_dimension_numbers<[1], [0], [0], [1], [0, 0, 1, 1], [], []>} : vector<32x4xf32>, vector<4x32xf32>, vector<32x32xf32> -> vector<32x32xf32>
    %17 = arith.addf %14, %16 : vector<32x32xf32>
    %c0_11 = arith.constant 0 : index
    %c0_12 = arith.constant 0 : index
    %18 = vector.load %arg4[%c0_11, %c0_12] : memref<1x32xf32, #tpu.memory_space<vmem>>, vector<1x32xf32>
    %19 = vector.broadcast %18 : vector<1x32xf32> to vector<32x32xf32>
    %20 = arith.addf %17, %19 : vector<32x32xf32>
    %c0_13 = arith.constant 0 : index
    %c0_14 = arith.constant 0 : index
    %21 = vector.load %arg5[%c0_13, %c0_14] : memref<32x128xf32, #tpu.memory_space<vmem>>, vector<32x128xf32>
    %cst_15 = arith.constant dense<0.000000e+00> : vector<32x128xf32>
    %22 = tpu.matmul %20, %21, %cst_15 {dimension_numbers = #tpu.dot_dimension_numbers<[1], [0], [0], [1], [0, 0, 1, 1], [], []>} : vector<32x32xf32>, vector<32x128xf32>, vector<32x128xf32> -> vector<32x128xf32>
    %c0_16 = arith.constant 0 : index
    %c0_17 = arith.constant 0 : index
    %23 = vector.load %arg6[%c0_16, %c0_17] : memref<1x128xf32, #tpu.memory_space<vmem>>, vector<1x128xf32>
    %24 = vector.broadcast %23 : vector<1x128xf32> to vector<32x128xf32>
    %25 = arith.addf %22, %24 : vector<32x128xf32>
    %26 = vector.extract_strided_slice %25 {offsets = [0, 0], sizes = [32, 32], strides = [1, 1]} : vector<32x128xf32> to vector<32x32xf32>
    %27 = vector.extract_strided_slice %25 {offsets = [0, 32], sizes = [32, 32], strides = [1, 1]} : vector<32x128xf32> to vector<32x32xf32>
    %28 = vector.extract_strided_slice %25 {offsets = [0, 64], sizes = [32, 32], strides = [1, 1]} : vector<32x128xf32> to vector<32x32xf32>
    %29 = vector.extract_strided_slice %25 {offsets = [0, 96], sizes = [32, 32], strides = [1, 1]} : vector<32x128xf32> to vector<32x32xf32>
    %c0_18 = arith.constant 0 : index
    %c0_19 = arith.constant 0 : index
    %30 = vector.load %arg7[%c0_18, %c0_19] : memref<32x32xf32, #tpu.memory_space<vmem>>, vector<32x32xf32>
    %c0_20 = arith.constant 0 : index
    %c0_21 = arith.constant 0 : index
    %31 = vector.load %arg8[%c0_20, %c0_21] : memref<32x32xf32, #tpu.memory_space<vmem>>, vector<32x32xf32>
    %c0_22 = arith.constant 0 : index
    %c0_23 = arith.constant 0 : index
    %32 = vector.load %arg9[%c0_22, %c0_23] : memref<32x32xf32, #tpu.memory_space<vmem>>, vector<32x32xf32>
    %c0_24 = arith.constant 0 : index
    %c0_25 = arith.constant 0 : index
    %33 = vector.load %arg10[%c0_24, %c0_25] : memref<32x32xf32, #tpu.memory_space<vmem>>, vector<32x32xf32>
    %cst_26 = arith.constant 0.000000e+00 : f32
    %34 = vector.broadcast %cst_26 : f32 to vector<4x32xf32>
    %cst_27 = arith.constant 0.000000e+00 : f32
    %35 = vector.broadcast %cst_27 : f32 to vector<4x32xf32>
    %36 = vector.extract_strided_slice %26 {offsets = [0, 0], sizes = [4, 32], strides = [1, 1]} : vector<32x32xf32> to vector<4x32xf32>
    %cst_28 = arith.constant dense<0.000000e+00> : vector<4x32xf32>
    %37 = tpu.matmul %34, %30, %cst_28 {dimension_numbers = #tpu.dot_dimension_numbers<[1], [0], [0], [1], [0, 0, 1, 1], [], []>} : vector<4x32xf32>, vector<32x32xf32>, vector<4x32xf32> -> vector<4x32xf32>
    %38 = arith.addf %36, %37 : vector<4x32xf32>
    %39 = vector.extract_strided_slice %27 {offsets = [0, 0], sizes = [4, 32], strides = [1, 1]} : vector<32x32xf32> to vector<4x32xf32>
    %cst_29 = arith.constant dense<0.000000e+00> : vector<4x32xf32>
    %40 = tpu.matmul %34, %31, %cst_29 {dimension_numbers = #tpu.dot_dimension_numbers<[1], [0], [0], [1], [0, 0, 1, 1], [], []>} : vector<4x32xf32>, vector<32x32xf32>, vector<4x32xf32> -> vector<4x32xf32>
    %41 = arith.addf %39, %40 : vector<4x32xf32>
    %42 = vector.extract_strided_slice %28 {offsets = [0, 0], sizes = [4, 32], strides = [1, 1]} : vector<32x32xf32> to vector<4x32xf32>
    %cst_30 = arith.constant dense<0.000000e+00> : vector<4x32xf32>
    %43 = tpu.matmul %34, %32, %cst_30 {dimension_numbers = #tpu.dot_dimension_numbers<[1], [0], [0], [1], [0, 0, 1, 1], [], []>} : vector<4x32xf32>, vector<32x32xf32>, vector<4x32xf32> -> vector<4x32xf32>
    %44 = arith.addf %42, %43 : vector<4x32xf32>
    %45 = vector.extract_strided_slice %29 {offsets = [0, 0], sizes = [4, 32], strides = [1, 1]} : vector<32x32xf32> to vector<4x32xf32>
    %cst_31 = arith.constant dense<0.000000e+00> : vector<4x32xf32>
    %46 = tpu.matmul %34, %33, %cst_31 {dimension_numbers = #tpu.dot_dimension_numbers<[1], [0], [0], [1], [0, 0, 1, 1], [], []>} : vector<4x32xf32>, vector<32x32xf32>, vector<4x32xf32> -> vector<4x32xf32>
    %47 = arith.addf %45, %46 : vector<4x32xf32>
    %48 = arith.negf %41 : vector<4x32xf32>
    %49 = math.exp %48 : vector<4x32xf32>
    %cst_32 = arith.constant 1.000000e+00 : f32
    %50 = vector.broadcast %cst_32 : f32 to vector<4x32xf32>
    %51 = arith.addf %50, %49 : vector<4x32xf32>
    %52 = arith.divf %50, %51 : vector<4x32xf32>
    %53 = arith.mulf %52, %35 : vector<4x32xf32>
    %54 = arith.negf %38 : vector<4x32xf32>
    %55 = math.exp %54 : vector<4x32xf32>
    %cst_33 = arith.constant 1.000000e+00 : f32
    %56 = vector.broadcast %cst_33 : f32 to vector<4x32xf32>
    %57 = arith.addf %56, %55 : vector<4x32xf32>
    %58 = arith.divf %56, %57 : vector<4x32xf32>
    %59 = math.tanh %44 : vector<4x32xf32>
    %60 = arith.mulf %58, %59 : vector<4x32xf32>
    %61 = arith.addf %53, %60 : vector<4x32xf32>
    %62 = arith.negf %47 : vector<4x32xf32>
    %63 = math.exp %62 : vector<4x32xf32>
    %cst_34 = arith.constant 1.000000e+00 : f32
    %64 = vector.broadcast %cst_34 : f32 to vector<4x32xf32>
    %65 = arith.addf %64, %63 : vector<4x32xf32>
    %66 = arith.divf %64, %65 : vector<4x32xf32>
    %67 = math.tanh %61 : vector<4x32xf32>
    %68 = arith.mulf %66, %67 : vector<4x32xf32>
    %c0_35 = arith.constant 0 : index
    %c0_36 = arith.constant 0 : index
    %69 = vector.load %arg16[%c0_35, %c0_36] : memref<32x32xf32, #tpu.memory_space<vmem>>, vector<4x32xf32>
    tpu.vector_store %arg16[%c0_35, %c0_36], %68 {strides = array<i32>} : memref<32x32xf32, #tpu.memory_space<vmem>>, vector<4x32xf32>,
    %70 = vector.extract_strided_slice %26 {offsets = [4, 0], sizes = [4, 32], strides = [1, 1]} : vector<32x32xf32> to vector<4x32xf32>
    %cst_37 = arith.constant dense<0.000000e+00> : vector<4x32xf32>
    %71 = tpu.matmul %68, %30, %cst_37 {dimension_numbers = #tpu.dot_dimension_numbers<[1], [0], [0], [1], [0, 0, 1, 1], [], []>} : vector<4x32xf32>, vector<32x32xf32>, vector<4x32xf32> -> vector<4x32xf32>
    %72 = arith.addf %70, %71 : vector<4x32xf32>
    %73 = vector.extract_strided_slice %27 {offsets = [4, 0], sizes = [4, 32], strides = [1, 1]} : vector<32x32xf32> to vector<4x32xf32>
    %cst_38 = arith.constant dense<0.000000e+00> : vector<4x32xf32>
    %74 = tpu.matmul %68, %31, %cst_38 {dimension_numbers = #tpu.dot_dimension_numbers<[1], [0], [0], [1], [0, 0, 1, 1], [], []>} : vector<4x32xf32>, vector<32x32xf32>, vector<4x32xf32> -> vector<4x32xf32>
    %75 = arith.addf %73, %74 : vector<4x32xf32>
    %76 = vector.extract_strided_slice %28 {offsets = [4, 0], sizes = [4, 32], strides = [1, 1]} : vector<32x32xf32> to vector<4x32xf32>
    %cst_39 = arith.constant dense<0.000000e+00> : vector<4x32xf32>
    %77 = tpu.matmul %68, %32, %cst_39 {dimension_numbers = #tpu.dot_dimension_numbers<[1], [0], [0], [1], [0, 0, 1, 1], [], []>} : vector<4x32xf32>, vector<32x32xf32>, vector<4x32xf32> -> vector<4x32xf32>
    %78 = arith.addf %76, %77 : vector<4x32xf32>
    %79 = vector.extract_strided_slice %29 {offsets = [4, 0], sizes = [4, 32], strides = [1, 1]} : vector<32x32xf32> to vector<4x32xf32>
    %cst_40 = arith.constant dense<0.000000e+00> : vector<4x32xf32>
    %80 = tpu.matmul %68, %33, %cst_40 {dimension_numbers = #tpu.dot_dimension_numbers<[1], [0], [0], [1], [0, 0, 1, 1], [], []>} : vector<4x32xf32>, vector<32x32xf32>, vector<4x32xf32> -> vector<4x32xf32>
    %81 = arith.addf %79, %80 : vector<4x32xf32>
    %82 = arith.negf %75 : vector<4x32xf32>
    %83 = math.exp %82 : vector<4x32xf32>
    %cst_41 = arith.constant 1.000000e+00 : f32
    %84 = vector.broadcast %cst_41 : f32 to vector<4x32xf32>
    %85 = arith.addf %84, %83 : vector<4x32xf32>
    %86 = arith.divf %84, %85 : vector<4x32xf32>
    %87 = arith.mulf %86, %61 : vector<4x32xf32>
    %88 = arith.negf %72 : vector<4x32xf32>
    %89 = math.exp %88 : vector<4x32xf32>
    %cst_42 = arith.constant 1.000000e+00 : f32
    %90 = vector.broadcast %cst_42 : f32 to vector<4x32xf32>
    %91 = arith.addf %90, %89 : vector<4x32xf32>
    %92 = arith.divf %90, %91 : vector<4x32xf32>
    %93 = math.tanh %78 : vector<4x32xf32>
    %94 = arith.mulf %92, %93 : vector<4x32xf32>
    %95 = arith.addf %87, %94 : vector<4x32xf32>
    %96 = arith.negf %81 : vector<4x32xf32>
    %97 = math.exp %96 : vector<4x32xf32>
    %cst_43 = arith.constant 1.000000e+00 : f32
    %98 = vector.broadcast %cst_43 : f32 to vector<4x32xf32>
    %99 = arith.addf %98, %97 : vector<4x32xf32>
    %100 = arith.divf %98, %99 : vector<4x32xf32>
    %101 = math.tanh %95 : vector<4x32xf32>
    %102 = arith.mulf %100, %101 : vector<4x32xf32>
    %c4 = arith.constant 4 : index
    %c0_44 = arith.constant 0 : index
    %103 = vector.load %arg16[%c4, %c0_44] : memref<32x32xf32, #tpu.memory_space<vmem>>, vector<4x32xf32>
    tpu.vector_store %arg16[%c4, %c0_44], %102 {strides = array<i32>} : memref<32x32xf32, #tpu.memory_space<vmem>>, vector<4x32xf32>,
    %104 = vector.extract_strided_slice %26 {offsets = [8, 0], sizes = [4, 32], strides = [1, 1]} : vector<32x32xf32> to vector<4x32xf32>
    %cst_45 = arith.constant dense<0.000000e+00> : vector<4x32xf32>
    %105 = tpu.matmul %102, %30, %cst_45 {dimension_numbers = #tpu.dot_dimension_numbers<[1], [0], [0], [1], [0, 0, 1, 1], [], []>} : vector<4x32xf32>, vector<32x32xf32>, vector<4x32xf32> -> vector<4x32xf32>
    %106 = arith.addf %104, %105 : vector<4x32xf32>
    %107 = vector.extract_strided_slice %27 {offsets = [8, 0], sizes = [4, 32], strides = [1, 1]} : vector<32x32xf32> to vector<4x32xf32>
    %cst_46 = arith.constant dense<0.000000e+00> : vector<4x32xf32>
    %108 = tpu.matmul %102, %31, %cst_46 {dimension_numbers = #tpu.dot_dimension_numbers<[1], [0], [0], [1], [0, 0, 1, 1], [], []>} : vector<4x32xf32>, vector<32x32xf32>, vector<4x32xf32> -> vector<4x32xf32>
    %109 = arith.addf %107, %108 : vector<4x32xf32>
    %110 = vector.extract_strided_slice %28 {offsets = [8, 0], sizes = [4, 32], strides = [1, 1]} : vector<32x32xf32> to vector<4x32xf32>
    %cst_47 = arith.constant dense<0.000000e+00> : vector<4x32xf32>
    %111 = tpu.matmul %102, %32, %cst_47 {dimension_numbers = #tpu.dot_dimension_numbers<[1], [0], [0], [1], [0, 0, 1, 1], [], []>} : vector<4x32xf32>, vector<32x32xf32>, vector<4x32xf32> -> vector<4x32xf32>
    %112 = arith.addf %110, %111 : vector<4x32xf32>
    %113 = vector.extract_strided_slice %29 {offsets = [8, 0], sizes = [4, 32], strides = [1, 1]} : vector<32x32xf32> to vector<4x32xf32>
    %cst_48 = arith.constant dense<0.000000e+00> : vector<4x32xf32>
    %114 = tpu.matmul %102, %33, %cst_48 {dimension_numbers = #tpu.dot_dimension_numbers<[1], [0], [0], [1], [0, 0, 1, 1], [], []>} : vector<4x32xf32>, vector<32x32xf32>, vector<4x32xf32> -> vector<4x32xf32>
    %115 = arith.addf %113, %114 : vector<4x32xf32>
    %116 = arith.negf %109 : vector<4x32xf32>
    %117 = math.exp %116 : vector<4x32xf32>
    %cst_49 = arith.constant 1.000000e+00 : f32
    %118 = vector.broadcast %cst_49 : f32 to vector<4x32xf32>
    %119 = arith.addf %118, %117 : vector<4x32xf32>
    %120 = arith.divf %118, %119 : vector<4x32xf32>
    %121 = arith.mulf %120, %95 : vector<4x32xf32>
    %122 = arith.negf %106 : vector<4x32xf32>
    %123 = math.exp %122 : vector<4x32xf32>
    %cst_50 = arith.constant 1.000000e+00 : f32
    %124 = vector.broadcast %cst_50 : f32 to vector<4x32xf32>
    %125 = arith.addf %124, %123 : vector<4x32xf32>
    %126 = arith.divf %124, %125 : vector<4x32xf32>
    %127 = math.tanh %112 : vector<4x32xf32>
    %128 = arith.mulf %126, %127 : vector<4x32xf32>
    %129 = arith.addf %121, %128 : vector<4x32xf32>
    %130 = arith.negf %115 : vector<4x32xf32>
    %131 = math.exp %130 : vector<4x32xf32>
    %cst_51 = arith.constant 1.000000e+00 : f32
    %132 = vector.broadcast %cst_51 : f32 to vector<4x32xf32>
    %133 = arith.addf %132, %131 : vector<4x32xf32>
    %134 = arith.divf %132, %133 : vector<4x32xf32>
    %135 = math.tanh %129 : vector<4x32xf32>
    %136 = arith.mulf %134, %135 : vector<4x32xf32>
    %c8 = arith.constant 8 : index
    %c0_52 = arith.constant 0 : index
    %137 = vector.load %arg16[%c8, %c0_52] : memref<32x32xf32, #tpu.memory_space<vmem>>, vector<4x32xf32>
    tpu.vector_store %arg16[%c8, %c0_52], %136 {strides = array<i32>} : memref<32x32xf32, #tpu.memory_space<vmem>>, vector<4x32xf32>,
    %138 = vector.extract_strided_slice %26 {offsets = [12, 0], sizes = [4, 32], strides = [1, 1]} : vector<32x32xf32> to vector<4x32xf32>
    %cst_53 = arith.constant dense<0.000000e+00> : vector<4x32xf32>
    %139 = tpu.matmul %136, %30, %cst_53 {dimension_numbers = #tpu.dot_dimension_numbers<[1], [0], [0], [1], [0, 0, 1, 1], [], []>} : vector<4x32xf32>, vector<32x32xf32>, vector<4x32xf32> -> vector<4x32xf32>
    %140 = arith.addf %138, %139 : vector<4x32xf32>
    %141 = vector.extract_strided_slice %27 {offsets = [12, 0], sizes = [4, 32], strides = [1, 1]} : vector<32x32xf32> to vector<4x32xf32>
    %cst_54 = arith.constant dense<0.000000e+00> : vector<4x32xf32>
    %142 = tpu.matmul %136, %31, %cst_54 {dimension_numbers = #tpu.dot_dimension_numbers<[1], [0], [0], [1], [0, 0, 1, 1], [], []>} : vector<4x32xf32>, vector<32x32xf32>, vector<4x32xf32> -> vector<4x32xf32>
    %143 = arith.addf %141, %142 : vector<4x32xf32>
    %144 = vector.extract_strided_slice %28 {offsets = [12, 0], sizes = [4, 32], strides = [1, 1]} : vector<32x32xf32> to vector<4x32xf32>
    %cst_55 = arith.constant dense<0.000000e+00> : vector<4x32xf32>
    %145 = tpu.matmul %136, %32, %cst_55 {dimension_numbers = #tpu.dot_dimension_numbers<[1], [0], [0], [1], [0, 0, 1, 1], [], []>} : vector<4x32xf32>, vector<32x32xf32>, vector<4x32xf32> -> vector<4x32xf32>
    %146 = arith.addf %144, %145 : vector<4x32xf32>
    %147 = vector.extract_strided_slice %29 {offsets = [12, 0], sizes = [4, 32], strides = [1, 1]} : vector<32x32xf32> to vector<4x32xf32>
    %cst_56 = arith.constant dense<0.000000e+00> : vector<4x32xf32>
    %148 = tpu.matmul %136, %33, %cst_56 {dimension_numbers = #tpu.dot_dimension_numbers<[1], [0], [0], [1], [0, 0, 1, 1], [], []>} : vector<4x32xf32>, vector<32x32xf32>, vector<4x32xf32> -> vector<4x32xf32>
    %149 = arith.addf %147, %148 : vector<4x32xf32>
    %150 = arith.negf %143 : vector<4x32xf32>
    %151 = math.exp %150 : vector<4x32xf32>
    %cst_57 = arith.constant 1.000000e+00 : f32
    %152 = vector.broadcast %cst_57 : f32 to vector<4x32xf32>
    %153 = arith.addf %152, %151 : vector<4x32xf32>
    %154 = arith.divf %152, %153 : vector<4x32xf32>
    %155 = arith.mulf %154, %129 : vector<4x32xf32>
    %156 = arith.negf %140 : vector<4x32xf32>
    %157 = math.exp %156 : vector<4x32xf32>
    %cst_58 = arith.constant 1.000000e+00 : f32
    %158 = vector.broadcast %cst_58 : f32 to vector<4x32xf32>
    %159 = arith.addf %158, %157 : vector<4x32xf32>
    %160 = arith.divf %158, %159 : vector<4x32xf32>
    %161 = math.tanh %146 : vector<4x32xf32>
    %162 = arith.mulf %160, %161 : vector<4x32xf32>
    %163 = arith.addf %155, %162 : vector<4x32xf32>
    %164 = arith.negf %149 : vector<4x32xf32>
    %165 = math.exp %164 : vector<4x32xf32>
    %cst_59 = arith.constant 1.000000e+00 : f32
    %166 = vector.broadcast %cst_59 : f32 to vector<4x32xf32>
    %167 = arith.addf %166, %165 : vector<4x32xf32>
    %168 = arith.divf %166, %167 : vector<4x32xf32>
    %169 = math.tanh %163 : vector<4x32xf32>
    %170 = arith.mulf %168, %169 : vector<4x32xf32>
    %c12 = arith.constant 12 : index
    %c0_60 = arith.constant 0 : index
    %171 = vector.load %arg16[%c12, %c0_60] : memref<32x32xf32, #tpu.memory_space<vmem>>, vector<4x32xf32>
    tpu.vector_store %arg16[%c12, %c0_60], %170 {strides = array<i32>} : memref<32x32xf32, #tpu.memory_space<vmem>>, vector<4x32xf32>,
    %172 = vector.extract_strided_slice %26 {offsets = [16, 0], sizes = [4, 32], strides = [1, 1]} : vector<32x32xf32> to vector<4x32xf32>
    %cst_61 = arith.constant dense<0.000000e+00> : vector<4x32xf32>
    %173 = tpu.matmul %170, %30, %cst_61 {dimension_numbers = #tpu.dot_dimension_numbers<[1], [0], [0], [1], [0, 0, 1, 1], [], []>} : vector<4x32xf32>, vector<32x32xf32>, vector<4x32xf32> -> vector<4x32xf32>
    %174 = arith.addf %172, %173 : vector<4x32xf32>
    %175 = vector.extract_strided_slice %27 {offsets = [16, 0], sizes = [4, 32], strides = [1, 1]} : vector<32x32xf32> to vector<4x32xf32>
    %cst_62 = arith.constant dense<0.000000e+00> : vector<4x32xf32>
    %176 = tpu.matmul %170, %31, %cst_62 {dimension_numbers = #tpu.dot_dimension_numbers<[1], [0], [0], [1], [0, 0, 1, 1], [], []>} : vector<4x32xf32>, vector<32x32xf32>, vector<4x32xf32> -> vector<4x32xf32>
    %177 = arith.addf %175, %176 : vector<4x32xf32>
    %178 = vector.extract_strided_slice %28 {offsets = [16, 0], sizes = [4, 32], strides = [1, 1]} : vector<32x32xf32> to vector<4x32xf32>
    %cst_63 = arith.constant dense<0.000000e+00> : vector<4x32xf32>
    %179 = tpu.matmul %170, %32, %cst_63 {dimension_numbers = #tpu.dot_dimension_numbers<[1], [0], [0], [1], [0, 0, 1, 1], [], []>} : vector<4x32xf32>, vector<32x32xf32>, vector<4x32xf32> -> vector<4x32xf32>
    %180 = arith.addf %178, %179 : vector<4x32xf32>
    %181 = vector.extract_strided_slice %29 {offsets = [16, 0], sizes = [4, 32], strides = [1, 1]} : vector<32x32xf32> to vector<4x32xf32>
    %cst_64 = arith.constant dense<0.000000e+00> : vector<4x32xf32>
    %182 = tpu.matmul %170, %33, %cst_64 {dimension_numbers = #tpu.dot_dimension_numbers<[1], [0], [0], [1], [0, 0, 1, 1], [], []>} : vector<4x32xf32>, vector<32x32xf32>, vector<4x32xf32> -> vector<4x32xf32>
    %183 = arith.addf %181, %182 : vector<4x32xf32>
    %184 = arith.negf %177 : vector<4x32xf32>
    %185 = math.exp %184 : vector<4x32xf32>
    %cst_65 = arith.constant 1.000000e+00 : f32
    %186 = vector.broadcast %cst_65 : f32 to vector<4x32xf32>
    %187 = arith.addf %186, %185 : vector<4x32xf32>
    %188 = arith.divf %186, %187 : vector<4x32xf32>
    %189 = arith.mulf %188, %163 : vector<4x32xf32>
    %190 = arith.negf %174 : vector<4x32xf32>
    %191 = math.exp %190 : vector<4x32xf32>
    %cst_66 = arith.constant 1.000000e+00 : f32
    %192 = vector.broadcast %cst_66 : f32 to vector<4x32xf32>
    %193 = arith.addf %192, %191 : vector<4x32xf32>
    %194 = arith.divf %192, %193 : vector<4x32xf32>
    %195 = math.tanh %180 : vector<4x32xf32>
    %196 = arith.mulf %194, %195 : vector<4x32xf32>
    %197 = arith.addf %189, %196 : vector<4x32xf32>
    %198 = arith.negf %183 : vector<4x32xf32>
    %199 = math.exp %198 : vector<4x32xf32>
    %cst_67 = arith.constant 1.000000e+00 : f32
    %200 = vector.broadcast %cst_67 : f32 to vector<4x32xf32>
    %201 = arith.addf %200, %199 : vector<4x32xf32>
    %202 = arith.divf %200, %201 : vector<4x32xf32>
    %203 = math.tanh %197 : vector<4x32xf32>
    %204 = arith.mulf %202, %203 : vector<4x32xf32>
    %c16 = arith.constant 16 : index
    %c0_68 = arith.constant 0 : index
    %205 = vector.load %arg16[%c16, %c0_68] : memref<32x32xf32, #tpu.memory_space<vmem>>, vector<4x32xf32>
    tpu.vector_store %arg16[%c16, %c0_68], %204 {strides = array<i32>} : memref<32x32xf32, #tpu.memory_space<vmem>>, vector<4x32xf32>,
    %206 = vector.extract_strided_slice %26 {offsets = [20, 0], sizes = [4, 32], strides = [1, 1]} : vector<32x32xf32> to vector<4x32xf32>
    %cst_69 = arith.constant dense<0.000000e+00> : vector<4x32xf32>
    %207 = tpu.matmul %204, %30, %cst_69 {dimension_numbers = #tpu.dot_dimension_numbers<[1], [0], [0], [1], [0, 0, 1, 1], [], []>} : vector<4x32xf32>, vector<32x32xf32>, vector<4x32xf32> -> vector<4x32xf32>
    %208 = arith.addf %206, %207 : vector<4x32xf32>
    %209 = vector.extract_strided_slice %27 {offsets = [20, 0], sizes = [4, 32], strides = [1, 1]} : vector<32x32xf32> to vector<4x32xf32>
    %cst_70 = arith.constant dense<0.000000e+00> : vector<4x32xf32>
    %210 = tpu.matmul %204, %31, %cst_70 {dimension_numbers = #tpu.dot_dimension_numbers<[1], [0], [0], [1], [0, 0, 1, 1], [], []>} : vector<4x32xf32>, vector<32x32xf32>, vector<4x32xf32> -> vector<4x32xf32>
    %211 = arith.addf %209, %210 : vector<4x32xf32>
    %212 = vector.extract_strided_slice %28 {offsets = [20, 0], sizes = [4, 32], strides = [1, 1]} : vector<32x32xf32> to vector<4x32xf32>
    %cst_71 = arith.constant dense<0.000000e+00> : vector<4x32xf32>
    %213 = tpu.matmul %204, %32, %cst_71 {dimension_numbers = #tpu.dot_dimension_numbers<[1], [0], [0], [1], [0, 0, 1, 1], [], []>} : vector<4x32xf32>, vector<32x32xf32>, vector<4x32xf32> -> vector<4x32xf32>
    %214 = arith.addf %212, %213 : vector<4x32xf32>
    %215 = vector.extract_strided_slice %29 {offsets = [20, 0], sizes = [4, 32], strides = [1, 1]} : vector<32x32xf32> to vector<4x32xf32>
    %cst_72 = arith.constant dense<0.000000e+00> : vector<4x32xf32>
    %216 = tpu.matmul %204, %33, %cst_72 {dimension_numbers = #tpu.dot_dimension_numbers<[1], [0], [0], [1], [0, 0, 1, 1], [], []>} : vector<4x32xf32>, vector<32x32xf32>, vector<4x32xf32> -> vector<4x32xf32>
    %217 = arith.addf %215, %216 : vector<4x32xf32>
    %218 = arith.negf %211 : vector<4x32xf32>
    %219 = math.exp %218 : vector<4x32xf32>
    %cst_73 = arith.constant 1.000000e+00 : f32
    %220 = vector.broadcast %cst_73 : f32 to vector<4x32xf32>
    %221 = arith.addf %220, %219 : vector<4x32xf32>
    %222 = arith.divf %220, %221 : vector<4x32xf32>
    %223 = arith.mulf %222, %197 : vector<4x32xf32>
    %224 = arith.negf %208 : vector<4x32xf32>
    %225 = math.exp %224 : vector<4x32xf32>
    %cst_74 = arith.constant 1.000000e+00 : f32
    %226 = vector.broadcast %cst_74 : f32 to vector<4x32xf32>
    %227 = arith.addf %226, %225 : vector<4x32xf32>
    %228 = arith.divf %226, %227 : vector<4x32xf32>
    %229 = math.tanh %214 : vector<4x32xf32>
    %230 = arith.mulf %228, %229 : vector<4x32xf32>
    %231 = arith.addf %223, %230 : vector<4x32xf32>
    %232 = arith.negf %217 : vector<4x32xf32>
    %233 = math.exp %232 : vector<4x32xf32>
    %cst_75 = arith.constant 1.000000e+00 : f32
    %234 = vector.broadcast %cst_75 : f32 to vector<4x32xf32>
    %235 = arith.addf %234, %233 : vector<4x32xf32>
    %236 = arith.divf %234, %235 : vector<4x32xf32>
    %237 = math.tanh %231 : vector<4x32xf32>
    %238 = arith.mulf %236, %237 : vector<4x32xf32>
    %c20 = arith.constant 20 : index
    %c0_76 = arith.constant 0 : index
    %239 = vector.load %arg16[%c20, %c0_76] : memref<32x32xf32, #tpu.memory_space<vmem>>, vector<4x32xf32>
    tpu.vector_store %arg16[%c20, %c0_76], %238 {strides = array<i32>} : memref<32x32xf32, #tpu.memory_space<vmem>>, vector<4x32xf32>,
    %240 = vector.extract_strided_slice %26 {offsets = [24, 0], sizes = [4, 32], strides = [1, 1]} : vector<32x32xf32> to vector<4x32xf32>
    %cst_77 = arith.constant dense<0.000000e+00> : vector<4x32xf32>
    %241 = tpu.matmul %238, %30, %cst_77 {dimension_numbers = #tpu.dot_dimension_numbers<[1], [0], [0], [1], [0, 0, 1, 1], [], []>} : vector<4x32xf32>, vector<32x32xf32>, vector<4x32xf32> -> vector<4x32xf32>
    %242 = arith.addf %240, %241 : vector<4x32xf32>
    %243 = vector.extract_strided_slice %27 {offsets = [24, 0], sizes = [4, 32], strides = [1, 1]} : vector<32x32xf32> to vector<4x32xf32>
    %cst_78 = arith.constant dense<0.000000e+00> : vector<4x32xf32>
    %244 = tpu.matmul %238, %31, %cst_78 {dimension_numbers = #tpu.dot_dimension_numbers<[1], [0], [0], [1], [0, 0, 1, 1], [], []>} : vector<4x32xf32>, vector<32x32xf32>, vector<4x32xf32> -> vector<4x32xf32>
    %245 = arith.addf %243, %244 : vector<4x32xf32>
    %246 = vector.extract_strided_slice %28 {offsets = [24, 0], sizes = [4, 32], strides = [1, 1]} : vector<32x32xf32> to vector<4x32xf32>
    %cst_79 = arith.constant dense<0.000000e+00> : vector<4x32xf32>
    %247 = tpu.matmul %238, %32, %cst_79 {dimension_numbers = #tpu.dot_dimension_numbers<[1], [0], [0], [1], [0, 0, 1, 1], [], []>} : vector<4x32xf32>, vector<32x32xf32>, vector<4x32xf32> -> vector<4x32xf32>
    %248 = arith.addf %246, %247 : vector<4x32xf32>
    %249 = vector.extract_strided_slice %29 {offsets = [24, 0], sizes = [4, 32], strides = [1, 1]} : vector<32x32xf32> to vector<4x32xf32>
    %cst_80 = arith.constant dense<0.000000e+00> : vector<4x32xf32>
    %250 = tpu.matmul %238, %33, %cst_80 {dimension_numbers = #tpu.dot_dimension_numbers<[1], [0], [0], [1], [0, 0, 1, 1], [], []>} : vector<4x32xf32>, vector<32x32xf32>, vector<4x32xf32> -> vector<4x32xf32>
    %251 = arith.addf %249, %250 : vector<4x32xf32>
    %252 = arith.negf %245 : vector<4x32xf32>
    %253 = math.exp %252 : vector<4x32xf32>
    %cst_81 = arith.constant 1.000000e+00 : f32
    %254 = vector.broadcast %cst_81 : f32 to vector<4x32xf32>
    %255 = arith.addf %254, %253 : vector<4x32xf32>
    %256 = arith.divf %254, %255 : vector<4x32xf32>
    %257 = arith.mulf %256, %231 : vector<4x32xf32>
    %258 = arith.negf %242 : vector<4x32xf32>
    %259 = math.exp %258 : vector<4x32xf32>
    %cst_82 = arith.constant 1.000000e+00 : f32
    %260 = vector.broadcast %cst_82 : f32 to vector<4x32xf32>
    %261 = arith.addf %260, %259 : vector<4x32xf32>
    %262 = arith.divf %260, %261 : vector<4x32xf32>
    %263 = math.tanh %248 : vector<4x32xf32>
    %264 = arith.mulf %262, %263 : vector<4x32xf32>
    %265 = arith.addf %257, %264 : vector<4x32xf32>
    %266 = arith.negf %251 : vector<4x32xf32>
    %267 = math.exp %266 : vector<4x32xf32>
    %cst_83 = arith.constant 1.000000e+00 : f32
    %268 = vector.broadcast %cst_83 : f32 to vector<4x32xf32>
    %269 = arith.addf %268, %267 : vector<4x32xf32>
    %270 = arith.divf %268, %269 : vector<4x32xf32>
    %271 = math.tanh %265 : vector<4x32xf32>
    %272 = arith.mulf %270, %271 : vector<4x32xf32>
    %c24 = arith.constant 24 : index
    %c0_84 = arith.constant 0 : index
    %273 = vector.load %arg16[%c24, %c0_84] : memref<32x32xf32, #tpu.memory_space<vmem>>, vector<4x32xf32>
    tpu.vector_store %arg16[%c24, %c0_84], %272 {strides = array<i32>} : memref<32x32xf32, #tpu.memory_space<vmem>>, vector<4x32xf32>,
    %274 = vector.extract_strided_slice %26 {offsets = [28, 0], sizes = [4, 32], strides = [1, 1]} : vector<32x32xf32> to vector<4x32xf32>
    %cst_85 = arith.constant dense<0.000000e+00> : vector<4x32xf32>
    %275 = tpu.matmul %272, %30, %cst_85 {dimension_numbers = #tpu.dot_dimension_numbers<[1], [0], [0], [1], [0, 0, 1, 1], [], []>} : vector<4x32xf32>, vector<32x32xf32>, vector<4x32xf32> -> vector<4x32xf32>
    %276 = arith.addf %274, %275 : vector<4x32xf32>
    %277 = vector.extract_strided_slice %27 {offsets = [28, 0], sizes = [4, 32], strides = [1, 1]} : vector<32x32xf32> to vector<4x32xf32>
    %cst_86 = arith.constant dense<0.000000e+00> : vector<4x32xf32>
    %278 = tpu.matmul %272, %31, %cst_86 {dimension_numbers = #tpu.dot_dimension_numbers<[1], [0], [0], [1], [0, 0, 1, 1], [], []>} : vector<4x32xf32>, vector<32x32xf32>, vector<4x32xf32> -> vector<4x32xf32>
    %279 = arith.addf %277, %278 : vector<4x32xf32>
    %280 = vector.extract_strided_slice %28 {offsets = [28, 0], sizes = [4, 32], strides = [1, 1]} : vector<32x32xf32> to vector<4x32xf32>
    %cst_87 = arith.constant dense<0.000000e+00> : vector<4x32xf32>
    %281 = tpu.matmul %272, %32, %cst_87 {dimension_numbers = #tpu.dot_dimension_numbers<[1], [0], [0], [1], [0, 0, 1, 1], [], []>} : vector<4x32xf32>, vector<32x32xf32>, vector<4x32xf32> -> vector<4x32xf32>
    %282 = arith.addf %280, %281 : vector<4x32xf32>
    %283 = vector.extract_strided_slice %29 {offsets = [28, 0], sizes = [4, 32], strides = [1, 1]} : vector<32x32xf32> to vector<4x32xf32>
    %cst_88 = arith.constant dense<0.000000e+00> : vector<4x32xf32>
    %284 = tpu.matmul %272, %33, %cst_88 {dimension_numbers = #tpu.dot_dimension_numbers<[1], [0], [0], [1], [0, 0, 1, 1], [], []>} : vector<4x32xf32>, vector<32x32xf32>, vector<4x32xf32> -> vector<4x32xf32>
    %285 = arith.addf %283, %284 : vector<4x32xf32>
    %286 = arith.negf %279 : vector<4x32xf32>
    %287 = math.exp %286 : vector<4x32xf32>
    %cst_89 = arith.constant 1.000000e+00 : f32
    %288 = vector.broadcast %cst_89 : f32 to vector<4x32xf32>
    %289 = arith.addf %288, %287 : vector<4x32xf32>
    %290 = arith.divf %288, %289 : vector<4x32xf32>
    %291 = arith.mulf %290, %265 : vector<4x32xf32>
    %292 = arith.negf %276 : vector<4x32xf32>
    %293 = math.exp %292 : vector<4x32xf32>
    %cst_90 = arith.constant 1.000000e+00 : f32
    %294 = vector.broadcast %cst_90 : f32 to vector<4x32xf32>
    %295 = arith.addf %294, %293 : vector<4x32xf32>
    %296 = arith.divf %294, %295 : vector<4x32xf32>
    %297 = math.tanh %282 : vector<4x32xf32>
    %298 = arith.mulf %296, %297 : vector<4x32xf32>
    %299 = arith.addf %291, %298 : vector<4x32xf32>
    %300 = arith.negf %285 : vector<4x32xf32>
    %301 = math.exp %300 : vector<4x32xf32>
    %cst_91 = arith.constant 1.000000e+00 : f32
    %302 = vector.broadcast %cst_91 : f32 to vector<4x32xf32>
    %303 = arith.addf %302, %301 : vector<4x32xf32>
    %304 = arith.divf %302, %303 : vector<4x32xf32>
    %305 = math.tanh %299 : vector<4x32xf32>
    %306 = arith.mulf %304, %305 : vector<4x32xf32>
    %c28 = arith.constant 28 : index
    %c0_92 = arith.constant 0 : index
    %307 = vector.load %arg16[%c28, %c0_92] : memref<32x32xf32, #tpu.memory_space<vmem>>, vector<4x32xf32>
    tpu.vector_store %arg16[%c28, %c0_92], %306 {strides = array<i32>} : memref<32x32xf32, #tpu.memory_space<vmem>>, vector<4x32xf32>,
    %c0_93 = arith.constant 0 : index
    %c0_94 = arith.constant 0 : index
    %308 = vector.load %arg16[%c0_93, %c0_94] : memref<32x32xf32, #tpu.memory_space<vmem>>, vector<32x32xf32>
    %c0_95 = arith.constant 0 : index
    %c0_96 = arith.constant 0 : index
    %309 = vector.load %arg11[%c0_95, %c0_96] : memref<32x8xf32, #tpu.memory_space<vmem>>, vector<32x8xf32>
    %cst_97 = arith.constant dense<0.000000e+00> : vector<32x8xf32>
    %310 = tpu.matmul %308, %309, %cst_97 {dimension_numbers = #tpu.dot_dimension_numbers<[1], [0], [0], [1], [0, 0, 1, 1], [], []>} : vector<32x32xf32>, vector<32x8xf32>, vector<32x8xf32> -> vector<32x8xf32>
    %c0_98 = arith.constant 0 : index
    %c0_99 = arith.constant 0 : index
    %311 = vector.load %arg12[%c0_98, %c0_99] : memref<1x8xf32, #tpu.memory_space<vmem>>, vector<1x8xf32>
    %312 = vector.broadcast %311 : vector<1x8xf32> to vector<32x8xf32>
    %313 = arith.addf %310, %312 : vector<32x8xf32>
    %c0_100 = arith.constant 0 : index
    %c0_101 = arith.constant 0 : index
    %314 = vector.load %arg13[%c0_100, %c0_101] : memref<32x8xf32, #tpu.memory_space<vmem>>, vector<32x8xf32>
    tpu.vector_store %arg13[%c0_100, %c0_101], %313 {strides = array<i32>} : memref<32x8xf32, #tpu.memory_space<vmem>>, vector<32x8xf32>,
    %c0_102 = arith.constant 0 : index
    %c0_103 = arith.constant 0 : index
    %315 = vector.load %arg14[%c0_102, %c0_103] : memref<4x32xf32, #tpu.memory_space<vmem>>, vector<4x32xf32>
    tpu.vector_store %arg14[%c0_102, %c0_103], %306 {strides = array<i32>} : memref<4x32xf32, #tpu.memory_space<vmem>>, vector<4x32xf32>,
    %c0_104 = arith.constant 0 : index
    %c0_105 = arith.constant 0 : index
    %316 = vector.load %arg15[%c0_104, %c0_105] : memref<4x32xf32, #tpu.memory_space<vmem>>, vector<4x32xf32>
    tpu.vector_store %arg15[%c0_104, %c0_105], %299 {strides = array<i32>} : memref<4x32xf32, #tpu.memory_space<vmem>>, vector<4x32xf32>,
    return
  }
}

</mosaic_0001>

<bundles_post_ra>
// kernel: tpu_custom_call.1
= control target key start
LH: loop header
LB: loop body
LE: loop exit
PB: predicated region body
PF: predicated region fallthrough
CT: control target
= control target key end

     0   :  { %21 = vsyncpa [#allocation4], 0  ;;  %s5257_s0 = inlined_call_operand.vmem [shape: f32[32,12], index: 0, kind: input, shape index: {}]   ;;  %s5258_s1 = inlined_call_operand.vmem [shape: f32[32,4], index: 1, kind: input, shape index: {}]   ;;  %s5259_s2 = inlined_call_operand.hbm [shape: f32[12,32], index: 2, kind: input, shape index: {}]   ;;  %s5260_s3 = inlined_call_operand.hbm [shape: f32[4,32], index: 3, kind: input, shape index: {}]   ;;  %s5261_s4 = inlined_call_operand.hbm [shape: f32[1,32], index: 4, kind: input, shape index: {}]   ;;  %s5262_s5 = inlined_call_operand.vmem [shape: f32[32,128], index: 5, kind: input, shape index: {}]   ;;  %s5263_s6 = inlined_call_operand.hbm [shape: f32[1,128], index: 6, kind: input, shape index: {}]   ;;  %s5264_s7 = inlined_call_operand.vmem [shape: f32[32,32], index: 7, kind: input, shape index: {}]   ;;  %s5265_s8 = inlined_call_operand.vmem [shape: f32[32,32], index: 8, kind: input, shape index: {}]   ;;  %s5266_s9 = inlined_call_operand.vmem [shape: f32[32,32], index: 9, kind: input, shape index: {}]   ;;  %s5267_s10 = inlined_call_operand.hbm [shape: f32[32,32], index: 10, kind: input, shape index: {}]   ;;  %s5268_s11 = inlined_call_operand.vmem [shape: f32[32,8], index: 11, kind: input, shape index: {}]   ;;  %s5269_s12 = inlined_call_operand.vmem [shape: f32[1,8], index: 12, kind: input, shape index: {}]   ;;  %s5270_s13 = inlined_call_operand.vmem [shape: f32[32,8], index: 13, kind: output, shape index: {0}]   ;;  %s5271_s14 = inlined_call_operand.hbm [shape: f32[4,32], index: 14, kind: output, shape index: {1}]   ;;  %s5272_s15 = inlined_call_operand.hbm [shape: f32[4,32], index: 15, kind: output, shape index: {2}]  }
   0x1   :  { %22 = vsyncpa [#allocation7], 0 }
   0x2   :  { %23 = vsyncpa [#allocation10], 0 }
   0x3   :  { %24 = vsyncpa [#allocation5], 0 }
   0x4   :  { %25 = vsyncpa [#allocation14], 0  ;;  %s4414_s18 = smov [#allocation6]   ;;  %s4415_s20 = smov [#allocation9]  }
   0x5   :  { %s48_s19 = sshll.u32 %s4414_s18, 4  ;;  %s70_s21 = sshll.u32 %s4415_s20, 4  ;;  %s49_s19 = int_to_ptr.vmem [resolvable:$true] %s48_s19  ;;  %s71_s21 = int_to_ptr.vmem [resolvable:$true] %s70_s21 }
   0x6   :  { %s4272_s22 = scalar_lea.vmem %s49_s19, 64  ;;  %p4277_p1 = scmp.lt.s32.totalorder %s49_s19, %s49_s19 }
   0x7   :  { %p4273_p0 = scmp.ne.s32.totalorder %s49_s19, %s4272_s22  ;;  %p4278_p2 = scmp.lt.s32.totalorder %s4272_s22, %s4272_s22 }
   0x9   :  { %p4279_p3 = por %p4278_p2, %p4277_p1 }
   0xb   :  { %p4280_p4 = pnand %p4279_p3, %p4273_p0 }
   0xd   :  { %4283 = shalt.err (!%p4280_p4)
}
   0xe   :  { %51 = dma.hbm_to_vmem [thread:$0]  %s5260_s3, 64, %s49_s19, [#allocation7]  }
   0xf   :  { %s4292_s25 = scalar_lea.vmem %s71_s21, 16  ;;  %s4296_s26 = scalar_lea.vmem %s71_s21, 32 }
  0x10   :  { %p4293_p5 = scmp.ne.s32.totalorder %s71_s21, %s4292_s25  ;;  %p4297_p6 = scmp.lt.s32.totalorder %s71_s21, %s71_s21 }
  0x11   :  { %p4298_p7 = scmp.lt.s32.totalorder %s4296_s26, %s4292_s25 }
  0x13   :  { %p4299_p8 = por %p4298_p7, %p4297_p6 }
  0x15   :  { %p4300_p9 = pnand %p4299_p8, %p4293_p5 }
  0x17   :  { %4303 = shalt.err (!%p4300_p9)
}
  0x18   :  { %73 = dma.hbm_to_vmem [thread:$0]  %s5263_s6, 16, %s71_s21, [#allocation10]  }
  0x19   :  { %s4416_s29 = smov [#allocation3]  }
  0x1a   :  { %s35_s30 = sshll.u32 %s4416_s29, 4  ;;  %s36_s30 = int_to_ptr.vmem [resolvable:$true] %s35_s30 }
  0x1b   :  { %s4312_s16 = scalar_lea.vmem %s36_s30, 256  ;;  %p4317_p11 = scmp.lt.s32.totalorder %s36_s30, %s36_s30 }
  0x1c   :  { %p4313_p10 = scmp.ne.s32.totalorder %s36_s30, %s4312_s16  ;;  %p4318_p12 = scmp.lt.s32.totalorder %s4312_s16, %s4312_s16 }
  0x1e   :  { %p4319_p13 = por %p4318_p12, %p4317_p11 }
  0x20   :  { %p4320_p0 = pnand %p4319_p13, %p4313_p10 }
  0x22   :  { %4323 = shalt.err (!%p4320_p0)
}
  0x23   :  { %s4417_s3 = smov 128   ;;  %s4418_s17 = smov 8  }
  0x24   :  { %41 = dma.hbm_to_vmem [thread:$0]  %s5259_s2, 256, %s36_s30, [#allocation4], %s4417_s3, %s4417_s3, %s4418_s17  }
  0x25   :  { %s4419_s20 = smov [#allocation8]   ;;  %s4420_s6 = smov [#allocation11]  }
  0x26   :  { %s58_s22 = sshll.u32 %s4419_s20, 4  ;;  %s85_s21 = sshll.u32 %s4420_s6, 4  ;;  %s59_s22 = int_to_ptr.vmem [resolvable:$true] %s58_s22  ;;  %s86_s21 = int_to_ptr.vmem [resolvable:$true] %s85_s21 }
  0x27   :  { %s4332_s23 = scalar_lea.vmem %s59_s22, 16  ;;  %s4336_s24 = scalar_lea.vmem %s59_s22, 32 }
  0x28   :  { %p4333_p1 = scmp.ne.s32.totalorder %s59_s22, %s4332_s23  ;;  %p4337_p2 = scmp.lt.s32.totalorder %s59_s22, %s59_s22 }
  0x29   :  { %p4338_p3 = scmp.lt.s32.totalorder %s4336_s24, %s4332_s23 }
  0x2b   :  { %p4339_p4 = por %p4338_p3, %p4337_p2 }
  0x2d   :  { %p4340_p5 = pnand %p4339_p4, %p4333_p1 }
  0x2f   :  { %4343 = shalt.err (!%p4340_p5)
}
  0x30   :  { %61 = dma.hbm_to_vmem [thread:$0]  %s5261_s4, 16, %s59_s22, [#allocation7]  }
  0x31   :  { %s4352_s27 = scalar_lea.vmem %s86_s21, 512  ;;  %p4357_p7 = scmp.lt.s32.totalorder %s86_s21, %s86_s21 }
  0x32   :  { %p4353_p6 = scmp.ne.s32.totalorder %s86_s21, %s4352_s27  ;;  %p4358_p8 = scmp.lt.s32.totalorder %s4352_s27, %s4352_s27 }
  0x34   :  { %p4359_p9 = por %p4358_p8, %p4357_p7 }
  0x36   :  { %p4360_p10 = pnand %p4359_p9, %p4353_p6 }
  0x38   :  { %4363 = shalt.err (!%p4360_p10)
}
  0x39   :  { %91 = dma.hbm_to_vmem [thread:$0]  %s5267_s10, 512, %s86_s21, [#allocation10], %s4417_s3, %s4417_s3, %s4418_s17  }
  0x3a   :  { %4404 = dma.done.wait [#allocation4], 256  }
  0x3b   :  { %4405 = vsyncadd [#allocation4], 4294967040 }
  0x3c   :  { %4406 = dma.done.wait [#allocation7], 80  }
  0x3d   :  { %4407 = vsyncadd [#allocation7], 4294967216 }
  0x3e   :  { %4408 = dma.done.wait [#allocation10], 528  }
  0x3f   :  { %4409 = vsyncadd [#allocation10], 4294966768  ;;  %vm115_vm0 = vcmask 31744   ;;  %v111_v0 = vld [vmem:[%s5258_s1] sm:$0xff]  ;;  %v113_v1 = vld [vmem:[%s5258_s1 + $0x10] sm:$0xff]  ;;  %vm179_vm1 = vcmask 1043456  }
  0x40   :  { %v112_v2 = vld [vmem:[%s5258_s1 + $0x8] sm:$0xff]  ;;  %v116_v3 = vsel %vm115_vm0, %v111_v0, -inf  ;;  %v122_v4 = vsel %vm115_vm0, %v113_v1, -inf  ;;  %v114_v5 = vld [vmem:[%s5258_s1 + $0x18] sm:$0xff]  ;;  %v164_v29 = vld [vmem:[#allocation3] sm:$0xff]  ;;  %vm268_vm2 = vcmask 97280  }
  0x41   :  { %117 = vmax.xlane.f32.xlu0 %v116_v3  ;;  %123 = vmax.xlane.f32.xlu1 %v122_v4  ;;  %v119_v6 = vsel %vm115_vm0, %v112_v2, -inf  ;;  %v125_v7 = vsel %vm115_vm0, %v114_v5, -inf  ;;  %v165_v28 = vld [vmem:[#allocation3 + $0x8] sm:$0xf]  ;;  %v160_v30 = vld [vmem:[%s5257_s0] sm:$0xff]  ;;  %v162_v33 = vld [vmem:[%s5257_s0 + $0x10] sm:$0xff] }
  0x42   :  { %3700 = vmatprep.subr.msk.mxu1 %vm179_vm1, %v165_v28  ;;  %v166_v31 = vld [vmem:[#allocation6] sm:$0xf]  ;;  %3704 = vmatprep.mubr.msk.f32.mxu1 %vm268_vm2, %v160_v30  ;;  %v161_v32 = vld [vmem:[%s5257_s0 + $0x8] sm:$0xff]  ;;  %v163_v34 = vld [vmem:[%s5257_s0 + $0x18] sm:$0xff]  ;;  %v4421_v36 = vmov 0.0   ;;  %vm4422_vm3 = vmmov 0  }
  0x43   :  { %3701 = vmatpush3.msk.msra.mxu1 %vm179_vm1, %v165_v28  ;;  %3692 = vmatprep.subr.msk.mxu0 %vm179_vm1, %v166_v31  ;;  %v4570_v35 = vld [vmem:[%s5264_s7 + $0x18] sm:$0xff]  ;;  %v4576_v37 = vld [vmem:[%s5264_s7 + $0x10] sm:$0xff]  ;;  %v4585_v38 = vld [vmem:[%s5264_s7 + $0x8] sm:$0xff]  ;;  %s4423_s27 = smov 64   ;;  %vm391_vm4 = vcmask 261120   ;;  %s4424_s18 = smov 96  }
  0x44   :  { %3702 = vmatprep.subr.mxu1 %v164_v29  ;;  %3693 = vmatpush3.msk.msra.mxu0 %vm179_vm1, %v166_v31  ;;  %v4592_v39 = vld [vmem:[%s5264_s7] sm:$0xff]  ;;  %v4599_v40 = vld [vmem:[%s5266_s9 + $0x18] sm:$0xff]  ;;  %v4607_v41 = vld [vmem:[%s5266_s9 + $0x10] sm:$0xff]  ;;  %s4425_s19 = smov 32   ;;  %vm844_vm5 = vcmask 257024   ;;  %vm1193_vm6 = vcmask 261124  }
  0x45   :  { %120 = vmax.xlane.f32.xlu0 %v119_v6  ;;  %126 = vmax.xlane.f32.xlu1 %v125_v7  ;;  %v4616_v42 = vld [vmem:[%s5266_s9 + $0x8] sm:$0xff]  ;;  %v4623_v43 = vld [vmem:[%s5266_s9] sm:$0xff]  ;;  %v383_v44 = vld [vmem:[%s5262_s5 + $0x18] sm:$0xff] }
  0x46   :  { %3703 = vmatpush3.msra.mxu1 %v164_v29  ;;  %3710 = vmatprep.subr.mxu0 %v383_v44  ;;  %v382_v57 = vld [vmem:[%s5262_s5 + $0x10] sm:$0xff]  ;;  %v381_v58 = vld [vmem:[%s5262_s5 + $0x8] sm:$0xff]  ;;  %v380_v59 = vld [vmem:[%s5262_s5] sm:$0xff] }
  0x47   :  { %3705 = vmatmul.mubr.msk.f32.vlgmr.msra.gmra.mxu1 %vm268_vm2, %v161_v32  ;;  %3724 = vmatprep.subr.mxu1 %v4421_v36  ;;  %v3442_v7 = vld [vmem:[#allocation8] ss:$0 sm:$0xff] }
  0x48   :  { %3707 = vmatprep.mubr.msk.f32.mxu1 %vm268_vm2, %v162_v33  ;;  %3725 = vmatpush3.msra.mxu1 %v4570_v35 }
  0x49   :  { %3726 = vmatprep.subr.mxu1 %v4421_v36 }
  0x4a   :  { %3727 = vmatpush3.msra.mxu1 %v4576_v37 }
  0x4b   :  { %3708 = vmatmul.mubr.msk.f32.gmra.mxu1 %vm268_vm2, %v163_v34  ;;  %3728 = vmatprep.subr.mxu1 %v4421_v36 }
  0x4c   :  { %3732 = vmatprep.mubr.msk.f32.mxu1 %vm4422_vm3, %v4421_v36  ;;  %3729 = vmatpush3.msra.mxu1 %v4585_v38 }
  0x4d   :  { %3730 = vmatprep.subr.mxu1 %v4421_v36 }
  0x4e   :  { %3731 = vmatpush3.msra.mxu1 %v4592_v39 }
  0x4f   :  { %3746 = vmatprep.subr.mxu1 %v4421_v36  ;;  %3733 = vmatmul.mubr.f32.vlgmr.msra.gmra.mxu1 %v4421_v36 }
  0x50   :  { %3747 = vmatpush3.msra.mxu1 %v4599_v40  ;;  %3754 = vmatprep.mubr.msk.f32.mxu1 %vm4422_vm3, %v4421_v36 }
  0x51   :  { %3748 = vmatprep.subr.mxu1 %v4421_v36 }
  0x52   :  { %3749 = vmatpush3.msra.mxu1 %v4607_v41 }
  0x53   :  { %3750 = vmatprep.subr.mxu1 %v4421_v36 }
  0x54   :  { %3751 = vmatpush3.msra.mxu1 %v4616_v42 }
  0x55   :  { %3752 = vmatprep.subr.mxu1 %v4421_v36 }
  0x56   :  { %3753 = vmatpush3.msra.mxu1 %v4623_v43 }
  0x57   :  { %3755 = vmatmul.mubr.f32.vlgmr.msra.gmra.mxu1 %v4421_v36  ;;  %3768 = vmatprep.subr.mxu1 %v4421_v36 }
  0x58   :  { %3769 = vmatpush3.msra.mxu1 %v4570_v35  ;;  %3776 = vmatprep.mubr.msk.f32.mxu1 %vm4422_vm3, %v4421_v36 }
  0x59   :  { %3770 = vmatprep.subr.mxu1 %v4421_v36 }
  0x5a   :  { %3771 = vmatpush3.msra.mxu1 %v4576_v37 }
  0x5b   :  { %3772 = vmatprep.subr.mxu1 %v4421_v36 }
  0x5c   :  { %3773 = vmatpush3.msra.mxu1 %v4585_v38 }
  0x5d   :  { %3774 = vmatprep.subr.mxu1 %v4421_v36 }
  0x5e   :  { %3775 = vmatpush3.msra.mxu1 %v4592_v39 }
  0x5f   :  { %3790 = vmatprep.subr.mxu1 %v4421_v36 }
  0xca   :  { %v118_v8 = vpop.xlane.xlu0 %117  ;;  %v124_v9 = vpop.xlane.xlu1 %123 }
  0xcb   :  { %v128_v10 = vsub.f32 %v111_v0, %v118_v8  ;;  %v130_v11 = vsub.f32 %v113_v1, %v124_v9 }
  0xcd   :  { %v132_v12 = vmul.f32 1.442695, %v128_v10  ;;  %v136_v13 = vmul.f32 1.442695, %v130_v11 }
  0xce   :  { %v121_v14 = vpop.xlane.xlu0 %120  ;;  %v127_v15 = vpop.xlane.xlu1 %126 }
  0xcf   :  { %4104 = vpow2.f32 %v132_v12  ;;  %v129_v16 = vsub.f32 %v112_v2, %v121_v14  ;;  %v131_v17 = vsub.f32 %v114_v5, %v127_v15  ;;  %v4667_v14 = vld [vmem:[%s5265_s8 + $0x18] sm:$0xff] }
  0xd0   :  { %4106 = vpow2.f32 %v136_v13 }
  0xd1   :  { %v134_v18 = vmul.f32 1.442695, %v129_v16  ;;  %v138_v19 = vmul.f32 1.442695, %v131_v17  ;;  %v4674_v16 = vld [vmem:[%s5265_s8 + $0x10] sm:$0xff] }
  0xd3   :  { %4108 = vpow2.f32 %v134_v18 }
  0xd4   :  { %4110 = vpow2.f32 %v138_v19  ;;  %v4681_v19 = vld [vmem:[%s5265_s8 + $0x8] sm:$0xff] }
  0xdc   :  { %v4539_v20 = vpop.eup %4104 }
  0xdd   :  { %v4541_v21 = vpop.eup %4106  ;;  %v140_v22 = vsel %vm115_vm0, %v4539_v20, 0.0 }
  0xde   :  { %141 = vadd.xlane.f32.xlu0 %v140_v22  ;;  %v146_v23 = vsel %vm115_vm0, %v4541_v21, 0.0  ;;  %v4701_v22 = vld [vmem:[#allocation11 + $0x10] sm:$0xff] }
  0xe0   :  { %v4547_v24 = vpop.eup %4108 }
  0xe1   :  { %v4549_v25 = vpop.eup %4110  ;;  %v143_v26 = vsel %vm115_vm0, %v4547_v24, 0.0 }
  0xe2   :  { %147 = vadd.xlane.f32.xlu0 %v146_v23  ;;  %144 = vadd.xlane.f32.xlu1 %v143_v26  ;;  %v149_v27 = vsel %vm115_vm0, %v4549_v25, 0.0  ;;  %v4707_v23 = vld [vmem:[#allocation11 + $0x8] sm:$0xff] }
  0xe6   :  { %150 = vadd.xlane.f32.xlu1 %v149_v27 }
 0x107   :  { %v3706_v60 = vpop.f32.mrf.mxu1 }
 0x109   :  { %v350_v61 = vpop.f32.mrf.mxu1 }
 0x10b   :  { %v3709_v62 = vpop.f32.mrf.mxu1 }
 0x10d   :  { %v360_v63 = vpop.f32.mrf.mxu1 }
 0x10f   :  { %v4661_v0 = vpop.f32.mrf.mxu1 }
 0x111   :  { %v3734_v1 = vpop.f32.mrf.mxu1 }
 0x117   :  { %v720_v2 = vpop.f32.mrf.mxu1 }
 0x118   :  { %725 = vrot.lane.b32.xlu0 %v720_v2, %s4423_s27 }
 0x119   :  { %v3756_v3 = vpop.f32.mrf.mxu1 }
 0x167   :  { %v142_v45 = vpop.xlane.xlu0 %141 }
 0x168   :  { %4112 = vrcp.f32 %v142_v45 }
 0x16b   :  { %v145_v46 = vpop.xlane.xlu1 %144  ;;  %v148_v47 = vpop.xlane.xlu0 %147 }
 0x16c   :  { %4114 = vrcp.f32 %v145_v46 }
 0x16d   :  { %4116 = vrcp.f32 %v148_v47 }
 0x16f   :  { %v151_v48 = vpop.xlane.xlu1 %150 }
 0x170   :  { %4118 = vrcp.f32 %v151_v48 }
 0x175   :  { %v4113_v49 = vpop.eup %4112 }
 0x176   :  { %v153_v50 = vmul.f32 %v4113_v49, %v4539_v20  ;;  %v4690_v20 = vld [vmem:[%s5265_s8] sm:$0xff] }
 0x178   :  { %3694 = vmatprep.mubr.msk.f32.mxu0 %vm115_vm0, %v153_v50 }
 0x179   :  { %v4115_v51 = vpop.eup %4114 }
 0x17a   :  { %v4117_v52 = vpop.eup %4116  ;;  %v155_v53 = vmul.f32 %v4115_v51, %v4547_v24  ;;  %v4711_v24 = vld [vmem:[#allocation11] sm:$0xff] }
 0x17b   :  { %v157_v54 = vmul.f32 %v4117_v52, %v4541_v21  ;;  %v4696_v21 = vld [vmem:[#allocation11 + $0x18] sm:$0xff] }
 0x17c   :  { %3695 = vmatmul.mubr.msk.f32.vlgmr.msra.gmra.mxu0 %vm115_vm0, %v155_v53 }
 0x17d   :  { %v4119_v55 = vpop.eup %4118  ;;  %3697 = vmatprep.mubr.msk.f32.mxu0 %vm115_vm0, %v157_v54  ;;  %3711 = vmatpush3.msra.mxu0 %v383_v44 }
 0x17e   :  { %v159_v56 = vmul.f32 %v4119_v55, %v4549_v25  ;;  %3712 = vmatprep.subr.mxu0 %v382_v57  ;;  %v3443_v25 = vld [vmem:[#allocation9] ss:$0 sm:$0xff] }
 0x17f   :  { %3713 = vmatpush3.msra.mxu0 %v382_v57 }
 0x180   :  { %3698 = vmatmul.mubr.msk.f32.gmra.mxu0 %vm115_vm0, %v159_v56  ;;  %3714 = vmatprep.subr.mxu0 %v381_v58 }
 0x181   :  { %3715 = vmatpush3.msra.mxu0 %v381_v58 }
 0x182   :  { %3716 = vmatprep.subr.mxu0 %v380_v59 }
 0x183   :  { %3717 = vmatpush3.msra.mxu0 %v380_v59 }
 0x184   :  { %3735 = vmatprep.subr.mxu0 %v4421_v36 }
 0x18a   :  { %v726_v29 = vpop.permute.xlu0 %725 }
 0x23c   :  { %v3696_v4 = vpop.f32.mrf.mxu0 }
 0x23d   :  { %v356_v5 = vadd.f32 %v3706_v60, %v3696_v4 }
 0x23e   :  { %v249_v6 = vpop.f32.mrf.mxu0 }
 0x23f   :  { %v351_v8 = vadd.f32 %v350_v61, %v249_v6  ;;  %v377_v11 = vadd.f32 %v3442_v7, %v356_v5 }
 0x240   :  { %v3699_v9 = vpop.f32.mrf.mxu0 }
 0x241   :  { %v376_v10 = vadd.f32 %v3442_v7, %v351_v8  ;;  %v366_v12 = vadd.f32 %v3709_v62, %v3699_v9 }
 0x242   :  { %v259_v13 = vpop.f32.mrf.mxu0 }
 0x243   :  { %v361_v15 = vadd.f32 %v360_v63, %v259_v13  ;;  %3718 = vmatprep.mubr.msk.f32.mxu0 %vm391_vm4, %v376_v10  ;;  %v379_v18 = vadd.f32 %v3442_v7, %v366_v12 }
 0x244   :  { %3719 = vmatmul.mubr.msk.f32.vlgmr.msra.gmra.mxu0 %vm391_vm4, %v377_v11 }
 0x245   :  { %v378_v17 = vadd.f32 %v3442_v7, %v361_v15  ;;  %3736 = vmatpush3.msra.mxu0 %v4667_v14 }
 0x246   :  { %3737 = vmatprep.subr.mxu0 %v4421_v36 }
 0x247   :  { %3738 = vmatpush3.msra.mxu0 %v4674_v16  ;;  %3721 = vmatprep.mubr.msk.f32.mxu0 %vm391_vm4, %v378_v17 }
 0x248   :  { %3739 = vmatprep.subr.mxu0 %v4421_v36  ;;  %3722 = vmatmul.mubr.msk.f32.gmra.mxu0 %vm391_vm4, %v379_v18 }
 0x249   :  { %3740 = vmatpush3.msra.mxu0 %v4681_v19  ;;  %3743 = vmatprep.mubr.msk.f32.mxu0 %vm4422_vm3, %v4421_v36 }
 0x24a   :  { %3741 = vmatprep.subr.mxu0 %v4421_v36 }
 0x24b   :  { %3742 = vmatpush3.msra.mxu0 %v4690_v20 }
 0x24c   :  { %3757 = vmatprep.subr.mxu0 %v4421_v36  ;;  %3744 = vmatmul.mubr.f32.vlgmr.msra.gmra.mxu0 %v4421_v36 }
 0x24d   :  { %3758 = vmatpush3.msra.mxu0 %v4696_v21  ;;  %3765 = vmatprep.mubr.msk.f32.mxu0 %vm4422_vm3, %v4421_v36 }
 0x24e   :  { %3759 = vmatprep.subr.mxu0 %v4421_v36 }
 0x24f   :  { %3760 = vmatpush3.msra.mxu0 %v4701_v22 }
 0x250   :  { %3761 = vmatprep.subr.mxu0 %v4421_v36 }
 0x251   :  { %3762 = vmatpush3.msra.mxu0 %v4707_v23 }
 0x252   :  { %3763 = vmatprep.subr.mxu0 %v4421_v36 }
 0x253   :  { %3764 = vmatpush3.msra.mxu0 %v4711_v24 }
 0x254   :  { %3766 = vmatmul.mubr.f32.vlgmr.msra.gmra.mxu0 %v4421_v36  ;;  %3779 = vmatprep.subr.mxu0 %v4421_v36 }
 0x255   :  { %3780 = vmatpush3.msra.mxu0 %v4667_v14  ;;  %3787 = vmatprep.mubr.msk.f32.mxu0 %vm4422_vm3, %v4421_v36 }
 0x256   :  { %3781 = vmatprep.subr.mxu0 %v4421_v36 }
 0x257   :  { %3782 = vmatpush3.msra.mxu0 %v4674_v16 }
 0x258   :  { %3783 = vmatprep.subr.mxu0 %v4421_v36 }
 0x259   :  { %3784 = vmatpush3.msra.mxu0 %v4681_v19 }
 0x25a   :  { %3785 = vmatprep.subr.mxu0 %v4421_v36 }
 0x25b   :  { %3786 = vmatpush3.msra.mxu0 %v4690_v20 }
 0x25c   :  { %3801 = vmatprep.subr.mxu0 %v4421_v36 }
 0x304   :  { %v3720_v26 = vpop.f32.mrf.mxu0 }
 0x305   :  { %v4728_v27 = vadd.f32 %v3720_v26, %v3443_v25 }
 0x306   :  { %v470_v28 = vpop.f32.mrf.mxu0 }
 0x307   :  { %v4730_v30 = vadd.f32 %v3443_v25, %v470_v28 }
 0x308   :  { %v3723_v31 = vpop.f32.mrf.mxu0 }
 0x309   :  { %v4732_v32 = vadd.f32 %v3723_v31, %v3443_v25  ;;  %v728_v33 = vadd.f32 %v726_v29, %v4730_v30  ;;  %v578_v50 = vadd.f32 %v4661_v0, %v4730_v30 }
 0x30a   :  { %v480_v34 = vpop.f32.mrf.mxu0 }
 0x30b   :  { %4120 = vtanh.f32 %v728_v33  ;;  %v4735_v44 = vadd.f32 %v3443_v25, %v480_v34  ;;  %v3449_v51 = vmul.f32 -1.442695, %v578_v50 }
 0x30c   :  { %v645_v45 = vpop.f32.mrf.mxu0 }
 0x30d   :  { %4122 = vpow2.f32 %v3449_v51 }
 0x30e   :  { %v3745_v46 = vpop.f32.mrf.mxu0 }
 0x314   :  { %v795_v47 = vpop.f32.mrf.mxu0 }
 0x315   :  { %800 = vrot.lane.b32.xlu0 %v795_v47, %s4424_s18 }
 0x316   :  { %v3767_v48 = vpop.f32.mrf.mxu0 }
 0x318   :  { %v4121_v49 = vpop.eup %4120 }
 0x319   :  { %819 = vrot.lane.b32.xlu1 %v4121_v49, %s4423_s27 }
 0x31a   :  { %v4123_v52 = vpop.eup %4122 }
 0x31b   :  { %v814_v53 = vadd.f32 1.0, %v4123_v52 }
 0x31d   :  { %650 = vrot.lane.b32.xlu1 %v645_v45, %s4425_s19  ;;  %4124 = vrcp.f32 %v814_v53 }
 0x32a   :  { %v4125_v54 = vpop.eup %4124 }
 0x387   :  { %v801_v3 = vpop.permute.xlu0 %800 }
 0x388   :  { %v803_v4 = vadd.f32 %v801_v3, %v4730_v30 }
 0x38a   :  { %v3450_v5 = vmul.f32 -1.442695, %v803_v4 }
 0x38b   :  { %v820_v55 = vpop.permute.xlu1 %819 }
 0x38c   :  { %v822_v56 = vmul.f32 %v4125_v54, %v820_v55 }
 0x38e   :  { %824 = vrot.lane.b32.xlu1 %v822_v56, %s4425_s19 }
 0x38f   :  { %v651_v57 = vpop.permute.xlu1 %650 }
 0x390   :  { %v653_v58 = vadd.f32 %v651_v57, %v4730_v30 }
 0x392   :  { %v3448_v59 = vmul.f32 -1.442695, %v653_v58 }
 0x394   :  { %4126 = vpow2.f32 %v3448_v59 }
 0x3a1   :  { %v4127_v60 = vpop.eup %4126 }
 0x3a2   :  { %v807_v61 = vadd.f32 1.0, %v4127_v60 }
 0x3a4   :  { %4128 = vrcp.f32 %v807_v61 }
 0x3b1   :  { %v4129_v62 = vpop.eup %4128 }
 0x3b2   :  { %v810_v63 = vmul.f32 0.0, %v4129_v62 }
 0x400   :  { %v825_v0 = vpop.permute.xlu1 %824 }
 0x401   :  { %v4744_v1 = vadd.f32 %v825_v0, %v810_v63 }
 0x403   :  { %4130 = vtanh.f32 %v4744_v1  ;;  %v1157_v61 = vrot.slane %v4744_v1, 4 }
 0x404   :  { %4132 = vpow2.f32 %v3450_v5 }
 0x410   :  { %v4131_v2 = vpop.eup %4130 }
 0x411   :  { %836 = vrot.lane.b32.xlu1 %v4131_v2, %s4423_s27  ;;  %v4133_v6 = vpop.eup %4132 }
 0x412   :  { %v831_v7 = vadd.f32 1.0, %v4133_v6 }
 0x414   :  { %4134 = vrcp.f32 %v831_v7 }
 0x421   :  { %v4135_v8 = vpop.eup %4134 }
 0x483   :  { %v837_v9 = vpop.permute.xlu1 %836 }
 0x484   :  { %v839_v10 = vmul.f32 %v4135_v8, %v837_v9 }
 0x486   :  { %841 = vrot.lane.b32.xlu0 %v839_v10, %s4425_s19 }
 0x4f8   :  { %v842_v11 = vpop.permute.xlu0 %841 }
 0x4f9   :  { %845 = vst.msk [vmem:[#allocation2] sm:$0xf] %vm844_vm5, %v842_v11  ;;  %3777 = vmatmul.mubr.msk.f32.vlgmr.msra.gmra.mxu1 %vm391_vm4, %v842_v11  ;;  %3788 = vmatmul.mubr.msk.f32.vlgmr.msra.gmra.mxu0 %vm391_vm4, %v842_v11 }
 0x4fa   :  { %3791 = vmatpush3.msra.mxu1 %v4599_v40  ;;  %3802 = vmatpush3.msra.mxu0 %v4696_v21 }
 0x4fb   :  { %3792 = vmatprep.subr.mxu1 %v4421_v36  ;;  %3803 = vmatprep.subr.mxu0 %v4421_v36 }
 0x4fc   :  { %3793 = vmatpush3.msra.mxu1 %v4607_v41  ;;  %3804 = vmatpush3.msra.mxu0 %v4701_v22 }
 0x4fd   :  { %3794 = vmatprep.subr.mxu1 %v4421_v36  ;;  %3805 = vmatprep.subr.mxu0 %v4421_v36 }
 0x4fe   :  { %3795 = vmatpush3.msra.mxu1 %v4616_v42  ;;  %3806 = vmatpush3.msra.mxu0 %v4707_v23 }
 0x4ff   :  { %3796 = vmatprep.subr.mxu1 %v4421_v36  ;;  %3807 = vmatprep.subr.mxu0 %v4421_v36 }
 0x500   :  { %3797 = vmatpush3.msra.mxu1 %v4623_v43  ;;  %3798 = vmatprep.mubr.msk.f32.mxu1 %vm4422_vm3, %v4421_v36 }
 0x501   :  { %3808 = vmatpush3.msra.mxu0 %v4711_v24  ;;  %3809 = vmatprep.mubr.msk.f32.mxu0 %vm4422_vm3, %v4421_v36 }
 0x502   :  { %3799 = vmatmul.mubr.msk.f32.vlgmr.msra.gmra.mxu1 %vm391_vm4, %v842_v11  ;;  %3810 = vmatmul.mubr.msk.f32.vlgmr.msra.gmra.mxu0 %vm391_vm4, %v842_v11 }
 0x503   :  { %3812 = vmatprep.subr.mxu1 %v4421_v36  ;;  %3823 = vmatprep.subr.mxu0 %v4421_v36 }
 0x504   :  { %3813 = vmatpush3.msra.mxu1 %v4570_v35  ;;  %3824 = vmatpush3.msra.mxu0 %v4667_v14 }
 0x505   :  { %3814 = vmatprep.subr.mxu1 %v4421_v36  ;;  %3825 = vmatprep.subr.mxu0 %v4421_v36 }
 0x506   :  { %3815 = vmatpush3.msra.mxu1 %v4576_v37  ;;  %3826 = vmatpush3.msra.mxu0 %v4674_v16 }
 0x507   :  { %3816 = vmatprep.subr.mxu1 %v4421_v36  ;;  %3827 = vmatprep.subr.mxu0 %v4421_v36 }
 0x508   :  { %3817 = vmatpush3.msra.mxu1 %v4585_v38  ;;  %3828 = vmatpush3.msra.mxu0 %v4681_v19 }
 0x509   :  { %3818 = vmatprep.subr.mxu1 %v4421_v36  ;;  %3829 = vmatprep.subr.mxu0 %v4421_v36 }
 0x50a   :  { %3819 = vmatpush3.msra.mxu1 %v4592_v39  ;;  %3830 = vmatpush3.msra.mxu0 %v4690_v20 }
 0x50b   :  { %3820 = vmatprep.mubr.msk.f32.mxu1 %vm4422_vm3, %v4421_v36  ;;  %3831 = vmatprep.mubr.msk.f32.mxu0 %vm4422_vm3, %v4421_v36 }
 0x50c   :  { %3834 = vmatprep.subr.mxu1 %v4421_v36  ;;  %3845 = vmatprep.subr.mxu0 %v4421_v36 }
 0x5b9   :  { %v914_v12 = vpop.f32.mrf.mxu1  ;;  %v988_v13 = vpop.f32.mrf.mxu0 }
 0x5ba   :  { %v993_v31 = vrot.slane %v988_v13, 4  ;;  %v919_v47 = vrot.slane %v914_v12, 4 }
 0x5bb   :  { %v3778_v15 = vpop.f32.mrf.mxu1  ;;  %v3789_v17 = vpop.f32.mrf.mxu0 }
 0x5bc   :  { %v921_v48 = vadd.f32 %v919_v47, %v4730_v30 }
 0x5be   :  { %v3456_v49 = vmul.f32 -1.442695, %v921_v48 }
 0x5c2   :  { %v1064_v18 = vpop.f32.mrf.mxu1  ;;  %v1140_v25 = vpop.f32.mrf.mxu0 }
 0x5c3   :  { %v1069_v26 = vrot.slane %v1064_v18, 4  ;;  %v1145_v33 = vrot.slane %v1140_v25, 4 }
 0x5c4   :  { %v3800_v28 = vpop.f32.mrf.mxu1  ;;  %v3811_v29 = vpop.f32.mrf.mxu0 }
 0x5c5   :  { %1070 = vrot.lane.b32.xlu1 %v1069_v26, %s4423_s27 }
 0x5c9   :  { %994 = vrot.lane.b32.xlu1 %v993_v31, %s4425_s19 }
 0x5cd   :  { %1146 = vrot.lane.b32.xlu1 %v1145_v33, %s4424_s18 }
 0x637   :  { %v1071_v34 = vpop.permute.xlu1 %1070 }
 0x638   :  { %v1073_v45 = vadd.f32 %v1071_v34, %v4730_v30 }
 0x63a   :  { %4136 = vtanh.f32 %v1073_v45 }
 0x63b   :  { %4138 = vpow2.f32 %v3456_v49  ;;  %v995_v55 = vpop.permute.xlu1 %994 }
 0x63c   :  { %v997_v56 = vadd.f32 %v995_v55, %v4730_v30 }
 0x63e   :  { %v3455_v57 = vmul.f32 -1.442695, %v997_v56 }
 0x63f   :  { %v1147_v3 = vpop.permute.xlu1 %1146 }
 0x640   :  { %v1149_v4 = vadd.f32 %v1147_v3, %v4730_v30 }
 0x642   :  { %v3457_v5 = vmul.f32 -1.442695, %v1149_v4 }
 0x647   :  { %v4137_v46 = vpop.eup %4136 }
 0x648   :  { %1168 = vrot.lane.b32.xlu0 %v4137_v46, %s4423_s27  ;;  %v4139_v50 = vpop.eup %4138 }
 0x649   :  { %v1163_v51 = vadd.f32 1.0, %v4139_v50 }
 0x64b   :  { %4140 = vrcp.f32 %v1163_v51 }
 0x64c   :  { %4142 = vpow2.f32 %v3455_v57 }
 0x658   :  { %v4141_v52 = vpop.eup %4140 }
 0x659   :  { %v4143_v58 = vpop.eup %4142 }
 0x65a   :  { %v1153_v59 = vadd.f32 1.0, %v4143_v58 }
 0x65c   :  { %4144 = vrcp.f32 %v1153_v59 }
 0x669   :  { %v4145_v60 = vpop.eup %4144 }
 0x66a   :  { %v1159_v62 = vmul.f32 %v4145_v60, %v1157_v61 }
 0x6ba   :  { %v1169_v53 = vpop.permute.xlu0 %1168 }
 0x6bb   :  { %v1171_v54 = vmul.f32 %v4141_v52, %v1169_v53 }
 0x6bd   :  { %1173 = vrot.lane.b32.xlu0 %v1171_v54, %s4425_s19 }
 0x72f   :  { %v1174_v63 = vpop.permute.xlu0 %1173 }
 0x730   :  { %v4804_v0 = vadd.f32 %v1174_v63, %v1159_v62 }
 0x732   :  { %4146 = vtanh.f32 %v4804_v0  ;;  %v1503_v56 = vrot.slane %v4804_v0, 4 }
 0x733   :  { %4148 = vpow2.f32 %v3457_v5 }
 0x73f   :  { %v4147_v2 = vpop.eup %4146 }
 0x740   :  { %1185 = vrot.lane.b32.xlu0 %v4147_v2, %s4423_s27  ;;  %v4149_v6 = vpop.eup %4148 }
 0x741   :  { %v1180_v7 = vadd.f32 1.0, %v4149_v6 }
 0x743   :  { %4150 = vrcp.f32 %v1180_v7 }
 0x750   :  { %v4151_v8 = vpop.eup %4150 }
 0x7b2   :  { %v1186_v9 = vpop.permute.xlu0 %1185 }
 0x7b3   :  { %v4809_v1 = vmul.f32 %v4151_v8, %v1186_v9 }
 0x7b5   :  { %v1195_v10 = vrot.slane %v4809_v1, 4 }
 0x7b7   :  { %1196 = vrot.lane.b32.xlu1 %v1195_v10, %s4425_s19 }
 0x829   :  { %v1197_v11 = vpop.permute.xlu1 %1196 }
 0x82a   :  { %3821 = vmatmul.mubr.msk.f32.vlgmr.msra.gmra.mxu1 %vm391_vm4, %v1197_v11  ;;  %3832 = vmatmul.mubr.msk.f32.vlgmr.msra.gmra.mxu0 %vm391_vm4, %v1197_v11 }
 0x82b   :  { %3835 = vmatpush3.msra.mxu1 %v4599_v40  ;;  %3846 = vmatpush3.msra.mxu0 %v4696_v21 }
 0x82c   :  { %3836 = vmatprep.subr.mxu1 %v4421_v36  ;;  %3847 = vmatprep.subr.mxu0 %v4421_v36 }
 0x82d   :  { %3837 = vmatpush3.msra.mxu1 %v4607_v41  ;;  %3848 = vmatpush3.msra.mxu0 %v4701_v22 }
 0x82e   :  { %3838 = vmatprep.subr.mxu1 %v4421_v36  ;;  %3849 = vmatprep.subr.mxu0 %v4421_v36 }
 0x82f   :  { %3839 = vmatpush3.msra.mxu1 %v4616_v42  ;;  %3850 = vmatpush3.msra.mxu0 %v4707_v23 }
 0x830   :  { %3840 = vmatprep.subr.mxu1 %v4421_v36  ;;  %3851 = vmatprep.subr.mxu0 %v4421_v36 }
 0x831   :  { %3841 = vmatpush3.msra.mxu1 %v4623_v43  ;;  %3842 = vmatprep.mubr.msk.f32.mxu1 %vm4422_vm3, %v4421_v36 }
 0x832   :  { %3852 = vmatpush3.msra.mxu0 %v4711_v24  ;;  %3853 = vmatprep.mubr.msk.f32.mxu0 %vm4422_vm3, %v4421_v36 }
 0x833   :  { %3843 = vmatmul.mubr.msk.f32.vlgmr.msra.gmra.mxu1 %vm391_vm4, %v1197_v11  ;;  %3854 = vmatmul.mubr.msk.f32.vlgmr.msra.gmra.mxu0 %vm391_vm4, %v1197_v11 }
 0x834   :  { %3856 = vmatprep.subr.mxu1 %v4421_v36  ;;  %3867 = vmatprep.subr.mxu0 %v4421_v36 }
 0x835   :  { %3857 = vmatpush3.msra.mxu1 %v4570_v35  ;;  %3868 = vmatpush3.msra.mxu0 %v4667_v14 }
 0x836   :  { %3858 = vmatprep.subr.mxu1 %v4421_v36  ;;  %3869 = vmatprep.subr.mxu0 %v4421_v36 }
 0x837   :  { %3859 = vmatpush3.msra.mxu1 %v4576_v37  ;;  %3870 = vmatpush3.msra.mxu0 %v4674_v16 }
 0x838   :  { %3860 = vmatprep.subr.mxu1 %v4421_v36  ;;  %3871 = vmatprep.subr.mxu0 %v4421_v36 }
 0x839   :  { %3861 = vmatpush3.msra.mxu1 %v4585_v38  ;;  %3872 = vmatpush3.msra.mxu0 %v4681_v19 }
 0x83a   :  { %3862 = vmatprep.subr.mxu1 %v4421_v36  ;;  %3873 = vmatprep.subr.mxu0 %v4421_v36 }
 0x83b   :  { %3863 = vmatpush3.msra.mxu1 %v4592_v39  ;;  %3874 = vmatpush3.msra.mxu0 %v4690_v20 }
 0x83c   :  { %3864 = vmatprep.mubr.msk.f32.mxu1 %vm4422_vm3, %v4421_v36  ;;  %3875 = vmatprep.mubr.msk.f32.mxu0 %vm4422_vm3, %v4421_v36 }
 0x83d   :  { %3878 = vmatprep.subr.mxu1 %v4421_v36  ;;  %3889 = vmatprep.subr.mxu0 %v4421_v36 }
 0x8ea   :  { %v1266_v30 = vpop.f32.mrf.mxu1  ;;  %v1337_v12 = vpop.f32.mrf.mxu0 }
 0x8eb   :  { %v1270_v33 = vadd.f32 %v1266_v30, %v4728_v27 }
 0x8ec   :  { %v3822_v13 = vpop.f32.mrf.mxu1  ;;  %v3833_v15 = vpop.f32.mrf.mxu0 }
 0x8ed   :  { %v3463_v34 = vmul.f32 -1.442695, %v1270_v33 }
 0x8f3   :  { %v1412_v17 = vpop.f32.mrf.mxu1  ;;  %v1487_v18 = vpop.f32.mrf.mxu0 }
 0x8f4   :  { %1417 = vrot.lane.b32.xlu0 %v1412_v17, %s4423_s27 }
 0x8f5   :  { %v3844_v25 = vpop.f32.mrf.mxu1  ;;  %v3855_v26 = vpop.f32.mrf.mxu0 }
 0x8f8   :  { %1342 = vrot.lane.b32.xlu0 %v1337_v12, %s4425_s19 }
 0x8fc   :  { %1492 = vrot.lane.b32.xlu0 %v1487_v18, %s4424_s18 }
 0x966   :  { %v1418_v28 = vpop.permute.xlu0 %1417 }
 0x967   :  { %v1420_v29 = vadd.f32 %v1418_v28, %v4728_v27 }
 0x969   :  { %4152 = vtanh.f32 %v1420_v29 }
 0x96a   :  { %4154 = vpow2.f32 %v3463_v34  ;;  %v1343_v50 = vpop.permute.xlu0 %1342 }
 0x96b   :  { %v1345_v51 = vadd.f32 %v1343_v50, %v4728_v27 }
 0x96d   :  { %v3462_v52 = vmul.f32 -1.442695, %v1345_v51 }
 0x96e   :  { %v1493_v61 = vpop.permute.xlu0 %1492 }
 0x96f   :  { %v1495_v62 = vadd.f32 %v1493_v61, %v4728_v27 }
 0x971   :  { %v3464_v63 = vmul.f32 -1.442695, %v1495_v62 }
 0x976   :  { %v4153_v31 = vpop.eup %4152 }
 0x977   :  { %1514 = vrot.lane.b32.xlu1 %v4153_v31, %s4423_s27  ;;  %v4155_v45 = vpop.eup %4154 }
 0x978   :  { %v1509_v46 = vadd.f32 1.0, %v4155_v45 }
 0x97a   :  { %4156 = vrcp.f32 %v1509_v46 }
 0x97b   :  { %4158 = vpow2.f32 %v3462_v52 }
 0x987   :  { %v4157_v47 = vpop.eup %4156 }
 0x988   :  { %v4159_v53 = vpop.eup %4158 }
 0x989   :  { %v1499_v54 = vadd.f32 1.0, %v4159_v53 }
 0x98b   :  { %4160 = vrcp.f32 %v1499_v54 }
 0x998   :  { %v4161_v55 = vpop.eup %4160 }
 0x999   :  { %v1505_v57 = vmul.f32 %v4161_v55, %v1503_v56 }
 0x9e9   :  { %v1515_v48 = vpop.permute.xlu1 %1514 }
 0x9ea   :  { %v1517_v49 = vmul.f32 %v4157_v47, %v1515_v48 }
 0x9ec   :  { %1519 = vrot.lane.b32.xlu1 %v1517_v49, %s4425_s19 }
 0xa5e   :  { %v1520_v58 = vpop.permute.xlu1 %1519 }
 0xa5f   :  { %v4866_v59 = vadd.f32 %v1520_v58, %v1505_v57 }
 0xa61   :  { %4162 = vtanh.f32 %v4866_v59  ;;  %v1851_v55 = vrot.slane %v4866_v59, 4 }
 0xa62   :  { %4164 = vpow2.f32 %v3464_v63 }
 0xa6e   :  { %v4163_v60 = vpop.eup %4162 }
 0xa6f   :  { %1531 = vrot.lane.b32.xlu1 %v4163_v60, %s4423_s27  ;;  %v4165_v2 = vpop.eup %4164 }
 0xa70   :  { %v1526_v3 = vadd.f32 1.0, %v4165_v2 }
 0xa72   :  { %4166 = vrcp.f32 %v1526_v3 }
 0xa7f   :  { %v4167_v4 = vpop.eup %4166 }
 0xae1   :  { %v1532_v5 = vpop.permute.xlu1 %1531 }
 0xae2   :  { %v1534_v0 = vmul.f32 %v4167_v4, %v1532_v5 }
 0xae4   :  { %1536 = vrot.lane.b32.xlu0 %v1534_v0, %s4425_s19 }
 0xb56   :  { %v1537_v6 = vpop.permute.xlu0 %1536 }
 0xb57   :  { %1539 = vst.msk [vmem:[#allocation2 + $0x8] sm:$0xf] %vm844_vm5, %v1537_v6  ;;  %3865 = vmatmul.mubr.msk.f32.vlgmr.msra.gmra.mxu1 %vm391_vm4, %v1537_v6  ;;  %3876 = vmatmul.mubr.msk.f32.vlgmr.msra.gmra.mxu0 %vm391_vm4, %v1537_v6 }
 0xb58   :  { %3879 = vmatpush3.msra.mxu1 %v4599_v40  ;;  %3890 = vmatpush3.msra.mxu0 %v4696_v21 }
 0xb59   :  { %3880 = vmatprep.subr.mxu1 %v4421_v36  ;;  %3891 = vmatprep.subr.mxu0 %v4421_v36 }
 0xb5a   :  { %3881 = vmatpush3.msra.mxu1 %v4607_v41  ;;  %3892 = vmatpush3.msra.mxu0 %v4701_v22 }
 0xb5b   :  { %3882 = vmatprep.subr.mxu1 %v4421_v36  ;;  %3893 = vmatprep.subr.mxu0 %v4421_v36 }
 0xb5c   :  { %3883 = vmatpush3.msra.mxu1 %v4616_v42  ;;  %3894 = vmatpush3.msra.mxu0 %v4707_v23 }
 0xb5d   :  { %3884 = vmatprep.subr.mxu1 %v4421_v36  ;;  %3895 = vmatprep.subr.mxu0 %v4421_v36 }
 0xb5e   :  { %3885 = vmatpush3.msra.mxu1 %v4623_v43  ;;  %3886 = vmatprep.mubr.msk.f32.mxu1 %vm4422_vm3, %v4421_v36 }
 0xb5f   :  { %3896 = vmatpush3.msra.mxu0 %v4711_v24  ;;  %3897 = vmatprep.mubr.msk.f32.mxu0 %vm4422_vm3, %v4421_v36 }
 0xb60   :  { %3887 = vmatmul.mubr.msk.f32.vlgmr.msra.gmra.mxu1 %vm391_vm4, %v1537_v6  ;;  %3898 = vmatmul.mubr.msk.f32.vlgmr.msra.gmra.mxu0 %vm391_vm4, %v1537_v6 }
 0xb61   :  { %3900 = vmatprep.subr.mxu1 %v4421_v36  ;;  %3911 = vmatprep.subr.mxu0 %v4421_v36 }
 0xb62   :  { %3901 = vmatpush3.msra.mxu1 %v4570_v35  ;;  %3912 = vmatpush3.msra.mxu0 %v4667_v14 }
 0xb63   :  { %3902 = vmatprep.subr.mxu1 %v4421_v36  ;;  %3913 = vmatprep.subr.mxu0 %v4421_v36 }
 0xb64   :  { %3903 = vmatpush3.msra.mxu1 %v4576_v37  ;;  %3914 = vmatpush3.msra.mxu0 %v4674_v16 }
 0xb65   :  { %3904 = vmatprep.subr.mxu1 %v4421_v36  ;;  %3915 = vmatprep.subr.mxu0 %v4421_v36 }
 0xb66   :  { %3905 = vmatpush3.msra.mxu1 %v4585_v38  ;;  %3916 = vmatpush3.msra.mxu0 %v4681_v19 }
 0xb67   :  { %3906 = vmatprep.subr.mxu1 %v4421_v36  ;;  %3917 = vmatprep.subr.mxu0 %v4421_v36 }
 0xb68   :  { %3907 = vmatpush3.msra.mxu1 %v4592_v39  ;;  %3918 = vmatpush3.msra.mxu0 %v4690_v20 }
 0xb69   :  { %3908 = vmatprep.mubr.msk.f32.mxu1 %vm4422_vm3, %v4421_v36  ;;  %3919 = vmatprep.mubr.msk.f32.mxu0 %vm4422_vm3, %v4421_v36 }
 0xb6a   :  { %3922 = vmatprep.subr.mxu1 %v4421_v36  ;;  %3933 = vmatprep.subr.mxu0 %v4421_v36 }
 0xc17   :  { %v1608_v7 = vpop.f32.mrf.mxu1  ;;  %v1682_v8 = vpop.f32.mrf.mxu0 }
 0xc18   :  { %v1687_v17 = vrot.slane %v1682_v8, 4  ;;  %v1613_v29 = vrot.slane %v1608_v7, 4 }
 0xc19   :  { %v3866_v9 = vpop.f32.mrf.mxu1  ;;  %v3877_v10 = vpop.f32.mrf.mxu0 }
 0xc1a   :  { %v1615_v31 = vadd.f32 %v1613_v29, %v4728_v27 }
 0xc1c   :  { %v3470_v33 = vmul.f32 -1.442695, %v1615_v31 }
 0xc20   :  { %v1758_v11 = vpop.f32.mrf.mxu1  ;;  %v1834_v30 = vpop.f32.mrf.mxu0 }
 0xc21   :  { %v1763_v12 = vrot.slane %v1758_v11, 4  ;;  %v1839_v18 = vrot.slane %v1834_v30, 4 }
 0xc22   :  { %v3888_v13 = vpop.f32.mrf.mxu1  ;;  %v3899_v15 = vpop.f32.mrf.mxu0 }
 0xc23   :  { %1764 = vrot.lane.b32.xlu1 %v1763_v12, %s4423_s27 }
 0xc27   :  { %1688 = vrot.lane.b32.xlu1 %v1687_v17, %s4425_s19 }
 0xc2b   :  { %1840 = vrot.lane.b32.xlu1 %v1839_v18, %s4424_s18 }
 0xc95   :  { %v1765_v25 = vpop.permute.xlu1 %1764 }
 0xc96   :  { %v1767_v26 = vadd.f32 %v1765_v25, %v4728_v27 }
 0xc98   :  { %4168 = vtanh.f32 %v1767_v26 }
 0xc99   :  { %4170 = vpow2.f32 %v3470_v33  ;;  %v1689_v49 = vpop.permute.xlu1 %1688 }
 0xc9a   :  { %v1691_v50 = vadd.f32 %v1689_v49, %v4728_v27 }
 0xc9c   :  { %v3469_v51 = vmul.f32 -1.442695, %v1691_v50 }
 0xc9d   :  { %v1841_v61 = vpop.permute.xlu1 %1840 }
 0xc9e   :  { %v1843_v62 = vadd.f32 %v1841_v61, %v4728_v27 }
 0xca0   :  { %v3471_v63 = vmul.f32 -1.442695, %v1843_v62 }
 0xca5   :  { %v4169_v28 = vpop.eup %4168 }
 0xca6   :  { %1862 = vrot.lane.b32.xlu0 %v4169_v28, %s4423_s27  ;;  %v4171_v34 = vpop.eup %4170 }
 0xca7   :  { %v1857_v45 = vadd.f32 1.0, %v4171_v34 }
 0xca9   :  { %4172 = vrcp.f32 %v1857_v45 }
 0xcaa   :  { %4174 = vpow2.f32 %v3469_v51 }
 0xcb6   :  { %v4173_v46 = vpop.eup %4172 }
 0xcb7   :  { %v4175_v52 = vpop.eup %4174 }
 0xcb8   :  { %v1847_v53 = vadd.f32 1.0, %v4175_v52 }
 0xcba   :  { %4176 = vrcp.f32 %v1847_v53 }
 0xcc7   :  { %v4177_v54 = vpop.eup %4176 }
 0xcc8   :  { %v1853_v56 = vmul.f32 %v4177_v54, %v1851_v55 }
 0xd18   :  { %v1863_v47 = vpop.permute.xlu0 %1862 }
 0xd19   :  { %v1865_v48 = vmul.f32 %v4173_v46, %v1863_v47 }
 0xd1b   :  { %1867 = vrot.lane.b32.xlu0 %v1865_v48, %s4425_s19 }
 0xd8d   :  { %v1868_v57 = vpop.permute.xlu0 %1867 }
 0xd8e   :  { %v4926_v58 = vadd.f32 %v1868_v57, %v1853_v56  ;;  %v5000_v56 = vld [vmem:[%s5266_s9 + $0x18] sm:$0xff]  ;;  %v5009_v57 = vld [vmem:[%s5266_s9 + $0x10] sm:$0xff] }
 0xd90   :  { %4178 = vtanh.f32 %v4926_v58  ;;  %v2196_v31 = vrot.slane %v4926_v58, 4 }
 0xd91   :  { %4180 = vpow2.f32 %v3471_v63 }
 0xd9d   :  { %v4179_v60 = vpop.eup %4178 }
 0xd9e   :  { %1879 = vrot.lane.b32.xlu0 %v4179_v60, %s4423_s27  ;;  %v4181_v2 = vpop.eup %4180 }
 0xd9f   :  { %v1874_v3 = vadd.f32 1.0, %v4181_v2 }
 0xda1   :  { %4182 = vrcp.f32 %v1874_v3 }
 0xdae   :  { %v4183_v4 = vpop.eup %4182 }
 0xe10   :  { %v1880_v5 = vpop.permute.xlu0 %1879 }
 0xe11   :  { %v4931_v59 = vmul.f32 %v4183_v4, %v1880_v5 }
 0xe13   :  { %v1888_v0 = vrot.slane %v4931_v59, 4 }
 0xe15   :  { %1889 = vrot.lane.b32.xlu1 %v1888_v0, %s4425_s19 }
 0xe87   :  { %v1890_v6 = vpop.permute.xlu1 %1889 }
 0xe88   :  { %3909 = vmatmul.mubr.msk.f32.vlgmr.msra.gmra.mxu1 %vm391_vm4, %v1890_v6  ;;  %3920 = vmatmul.mubr.msk.f32.vlgmr.msra.gmra.mxu0 %vm391_vm4, %v1890_v6 }
 0xe89   :  { %3923 = vmatpush3.msra.mxu1 %v4599_v40  ;;  %3934 = vmatpush3.msra.mxu0 %v4696_v21 }
 0xe8a   :  { %3924 = vmatprep.subr.mxu1 %v4421_v36  ;;  %3935 = vmatprep.subr.mxu0 %v4421_v36 }
 0xe8b   :  { %3925 = vmatpush3.msra.mxu1 %v4607_v41  ;;  %3936 = vmatpush3.msra.mxu0 %v4701_v22 }
 0xe8c   :  { %3926 = vmatprep.subr.mxu1 %v4421_v36  ;;  %3937 = vmatprep.subr.mxu0 %v4421_v36 }
 0xe8d   :  { %3927 = vmatpush3.msra.mxu1 %v4616_v42  ;;  %3938 = vmatpush3.msra.mxu0 %v4707_v23 }
 0xe8e   :  { %3928 = vmatprep.subr.mxu1 %v4421_v36  ;;  %3939 = vmatprep.subr.mxu0 %v4421_v36 }
 0xe8f   :  { %3929 = vmatpush3.msra.mxu1 %v4623_v43  ;;  %3930 = vmatprep.mubr.msk.f32.mxu1 %vm4422_vm3, %v4421_v36 }
 0xe90   :  { %3940 = vmatpush3.msra.mxu0 %v4711_v24  ;;  %3941 = vmatprep.mubr.msk.f32.mxu0 %vm4422_vm3, %v4421_v36 }
 0xe91   :  { %3931 = vmatmul.mubr.msk.f32.vlgmr.msra.gmra.mxu1 %vm391_vm4, %v1890_v6  ;;  %3942 = vmatmul.mubr.msk.f32.vlgmr.msra.gmra.mxu0 %vm391_vm4, %v1890_v6 }
 0xe92   :  { %3944 = vmatprep.subr.mxu1 %v4421_v36  ;;  %3955 = vmatprep.subr.mxu0 %v4421_v36 }
 0xe93   :  { %3945 = vmatpush3.msra.mxu1 %v4570_v35  ;;  %3956 = vmatpush3.msra.mxu0 %v4667_v14 }
 0xe94   :  { %3946 = vmatprep.subr.mxu1 %v4421_v36  ;;  %3957 = vmatprep.subr.mxu0 %v4421_v36 }
 0xe95   :  { %3947 = vmatpush3.msra.mxu1 %v4576_v37  ;;  %3958 = vmatpush3.msra.mxu0 %v4674_v16 }
 0xe96   :  { %3948 = vmatprep.subr.mxu1 %v4421_v36  ;;  %3959 = vmatprep.subr.mxu0 %v4421_v36 }
 0xe97   :  { %3949 = vmatpush3.msra.mxu1 %v4585_v38  ;;  %3960 = vmatpush3.msra.mxu0 %v4681_v19 }
 0xe98   :  { %3950 = vmatprep.subr.mxu1 %v4421_v36  ;;  %3961 = vmatprep.subr.mxu0 %v4421_v36 }
 0xe99   :  { %3951 = vmatpush3.msra.mxu1 %v4592_v39  ;;  %3962 = vmatpush3.msra.mxu0 %v4690_v20 }
 0xe9a   :  { %3952 = vmatprep.mubr.msk.f32.mxu1 %vm4422_vm3, %v4421_v36  ;;  %3963 = vmatprep.mubr.msk.f32.mxu0 %vm4422_vm3, %v4421_v36 }
 0xe9b   :  { %3966 = vmatprep.subr.mxu1 %v4421_v36  ;;  %3977 = vmatprep.subr.mxu0 %v4421_v36 }
 0xf48   :  { %v1959_v35 = vpop.f32.mrf.mxu1  ;;  %v2030_v37 = vpop.f32.mrf.mxu0 }
 0xf49   :  { %v1963_v9 = vadd.f32 %v1959_v35, %v4735_v44 }
 0xf4a   :  { %v3910_v38 = vpop.f32.mrf.mxu1  ;;  %v3921_v40 = vpop.f32.mrf.mxu0 }
 0xf4b   :  { %v3477_v10 = vmul.f32 -1.442695, %v1963_v9 }
 0xf51   :  { %v2105_v41 = vpop.f32.mrf.mxu1  ;;  %v2180_v42 = vpop.f32.mrf.mxu0 }
 0xf52   :  { %2110 = vrot.lane.b32.xlu0 %v2105_v41, %s4423_s27 }
 0xf53   :  { %v3932_v39 = vpop.f32.mrf.mxu1  ;;  %v3943_v43 = vpop.f32.mrf.mxu0 }
 0xf56   :  { %2035 = vrot.lane.b32.xlu0 %v2030_v37, %s4425_s19 }
 0xf5a   :  { %2185 = vrot.lane.b32.xlu0 %v2180_v42, %s4424_s18 }
 0xfc4   :  { %v2111_v27 = vpop.permute.xlu0 %2110 }
 0xfc5   :  { %v2113_v7 = vadd.f32 %v2111_v27, %v4735_v44 }
 0xfc7   :  { %4184 = vtanh.f32 %v2113_v7 }
 0xfc8   :  { %4186 = vpow2.f32 %v3477_v10  ;;  %v2036_v17 = vpop.permute.xlu0 %2035 }
 0xfc9   :  { %v2038_v18 = vadd.f32 %v2036_v17, %v4735_v44 }
 0xfcb   :  { %v3476_v25 = vmul.f32 -1.442695, %v2038_v18 }
 0xfcc   :  { %v2186_v47 = vpop.permute.xlu0 %2185 }
 0xfcd   :  { %v2188_v48 = vadd.f32 %v2186_v47, %v4735_v44 }
 0xfcf   :  { %v3478_v49 = vmul.f32 -1.442695, %v2188_v48  ;;  %v5106_v48 = vld [vmem:[#allocation11 + $0x10] sm:$0xff] }
 0xfd4   :  { %v4185_v8 = vpop.eup %4184 }
 0xfd5   :  { %2207 = vrot.lane.b32.xlu1 %v4185_v8, %s4423_s27  ;;  %v4187_v11 = vpop.eup %4186 }
 0xfd6   :  { %v2202_v30 = vadd.f32 1.0, %v4187_v11 }
 0xfd8   :  { %4188 = vrcp.f32 %v2202_v30 }
 0xfd9   :  { %4190 = vpow2.f32 %v3476_v25 }
 0xfe5   :  { %v4189_v12 = vpop.eup %4188 }
 0xfe6   :  { %v4191_v26 = vpop.eup %4190 }
 0xfe7   :  { %v2192_v28 = vadd.f32 1.0, %v4191_v26 }
 0xfe9   :  { %4192 = vrcp.f32 %v2192_v28 }
 0xff6   :  { %v4193_v29 = vpop.eup %4192 }
 0xff7   :  { %v2198_v33 = vmul.f32 %v4193_v29, %v2196_v31 }
0x1047   :  { %v2208_v13 = vpop.permute.xlu1 %2207 }
0x1048   :  { %v2210_v15 = vmul.f32 %v4189_v12, %v2208_v13 }
0x104a   :  { %2212 = vrot.lane.b32.xlu1 %v2210_v15, %s4425_s19 }
0x10bc   :  { %v2213_v34 = vpop.permute.xlu1 %2212 }
0x10bd   :  { %v4988_v45 = vadd.f32 %v2213_v34, %v2198_v33 }
0x10bf   :  { %4194 = vtanh.f32 %v4988_v45  ;;  %v2544_v12 = vrot.slane %v4988_v45, 4 }
0x10c0   :  { %4196 = vpow2.f32 %v3478_v49  ;;  %v5112_v49 = vld [vmem:[#allocation11 + $0x8] sm:$0xff] }
0x10cc   :  { %v4195_v46 = vpop.eup %4194 }
0x10cd   :  { %2224 = vrot.lane.b32.xlu1 %v4195_v46, %s4423_s27  ;;  %v4197_v50 = vpop.eup %4196 }
0x10ce   :  { %v2219_v51 = vadd.f32 1.0, %v4197_v50  ;;  %v5120_v50 = vld [vmem:[#allocation11] sm:$0xff] }
0x10d0   :  { %4198 = vrcp.f32 %v2219_v51  ;;  %v4260_v51 = vld [vmem:[%s5265_s8 + $0x18] sm:$0xff] }
0x10dd   :  { %v4199_v52 = vpop.eup %4198 }
0x113f   :  { %v2225_v53 = vpop.permute.xlu1 %2224 }
0x1140   :  { %v2227_v54 = vmul.f32 %v4199_v52, %v2225_v53  ;;  %v4261_v52 = vld [vmem:[%s5265_s8 + $0x10] sm:$0xff]  ;;  %v4262_v53 = vld [vmem:[%s5265_s8 + $0x8] sm:$0xff] }
0x1142   :  { %2229 = vrot.lane.b32.xlu0 %v2227_v54, %s4425_s19  ;;  %v4263_v54 = vld [vmem:[%s5265_s8] sm:$0xff] }
0x11b4   :  { %v2230_v55 = vpop.permute.xlu0 %2229 }
0x11b5   :  { %2232 = vst.msk [vmem:[#allocation2 + $0x10] sm:$0xf] %vm844_vm5, %v2230_v55  ;;  %3953 = vmatmul.mubr.msk.f32.vlgmr.msra.gmra.mxu1 %vm391_vm4, %v2230_v55  ;;  %3964 = vmatmul.mubr.msk.f32.vlgmr.msra.gmra.mxu0 %vm391_vm4, %v2230_v55 }
0x11b6   :  { %3967 = vmatpush3.msra.mxu1 %v5000_v56  ;;  %3978 = vmatpush3.msra.mxu0 %v4696_v21  ;;  %v5018_v21 = vld [vmem:[%s5266_s9 + $0x8] sm:$0xff] }
0x11b7   :  { %3968 = vmatprep.subr.mxu1 %v4421_v36  ;;  %3979 = vmatprep.subr.mxu0 %v4421_v36 }
0x11b8   :  { %3969 = vmatpush3.msra.mxu1 %v5009_v57  ;;  %3980 = vmatpush3.msra.mxu0 %v4701_v22  ;;  %v5027_v22 = vld [vmem:[%s5266_s9] sm:$0xff] }
0x11b9   :  { %3970 = vmatprep.subr.mxu1 %v4421_v36  ;;  %3981 = vmatprep.subr.mxu0 %v4421_v36 }
0x11ba   :  { %3971 = vmatpush3.msra.mxu1 %v5018_v21  ;;  %3982 = vmatpush3.msra.mxu0 %v4707_v23  ;;  %v5042_v23 = vld [vmem:[%s5264_s7 + $0x18] sm:$0xff] }
0x11bb   :  { %3972 = vmatprep.subr.mxu1 %v4421_v36  ;;  %3983 = vmatprep.subr.mxu0 %v4421_v36 }
0x11bc   :  { %3973 = vmatpush3.msra.mxu1 %v5027_v22  ;;  %3974 = vmatprep.mubr.msk.f32.mxu1 %vm4422_vm3, %v4421_v36 }
0x11bd   :  { %3984 = vmatpush3.msra.mxu0 %v4711_v24  ;;  %3985 = vmatprep.mubr.msk.f32.mxu0 %vm4422_vm3, %v4421_v36  ;;  %v5051_v24 = vld [vmem:[%s5264_s7 + $0x10] sm:$0xff] }
0x11be   :  { %3975 = vmatmul.mubr.msk.f32.vlgmr.msra.gmra.mxu1 %vm391_vm4, %v2230_v55  ;;  %3986 = vmatmul.mubr.msk.f32.vlgmr.msra.gmra.mxu0 %vm391_vm4, %v2230_v55 }
0x11bf   :  { %3988 = vmatprep.subr.mxu1 %v4421_v36  ;;  %3999 = vmatprep.subr.mxu0 %v4421_v36 }
0x11c0   :  { %3989 = vmatpush3.msra.mxu1 %v5042_v23  ;;  %4000 = vmatpush3.msra.mxu0 %v4667_v14  ;;  %v5060_v14 = vld [vmem:[%s5264_s7 + $0x8] sm:$0xff] }
0x11c1   :  { %3990 = vmatprep.subr.mxu1 %v4421_v36  ;;  %4001 = vmatprep.subr.mxu0 %v4421_v36 }
0x11c2   :  { %3991 = vmatpush3.msra.mxu1 %v5051_v24  ;;  %4002 = vmatpush3.msra.mxu0 %v4674_v16  ;;  %v5069_v16 = vld [vmem:[%s5264_s7] sm:$0xff] }
0x11c3   :  { %3992 = vmatprep.subr.mxu1 %v4421_v36  ;;  %4003 = vmatprep.subr.mxu0 %v4421_v36 }
0x11c4   :  { %3993 = vmatpush3.msra.mxu1 %v5060_v14  ;;  %4004 = vmatpush3.msra.mxu0 %v4681_v19 }
0x11c5   :  { %3994 = vmatprep.subr.mxu1 %v4421_v36  ;;  %4005 = vmatprep.subr.mxu0 %v4421_v36 }
0x11c6   :  { %3995 = vmatpush3.msra.mxu1 %v5069_v16  ;;  %4006 = vmatpush3.msra.mxu0 %v4690_v20 }
0x11c7   :  { %3996 = vmatprep.mubr.msk.f32.mxu1 %vm4422_vm3, %v4421_v36  ;;  %4007 = vmatprep.mubr.msk.f32.mxu0 %vm4422_vm3, %v4421_v36 }
0x11c8   :  { %4010 = vmatprep.subr.mxu1 %v4421_v36  ;;  %4021 = vmatprep.subr.mxu0 %v4421_v36 }
0x1275   :  { %v2301_v19 = vpop.f32.mrf.mxu1  ;;  %v2375_v58 = vpop.f32.mrf.mxu0 }
0x1276   :  { %v2380_v20 = vrot.slane %v2375_v58, 4  ;;  %v2306_v37 = vrot.slane %v2301_v19, 4 }
0x1277   :  { %v3954_v60 = vpop.f32.mrf.mxu1  ;;  %v3965_v61 = vpop.f32.mrf.mxu0 }
0x1278   :  { %v2308_v38 = vadd.f32 %v2306_v37, %v4735_v44 }
0x127a   :  { %v3484_v40 = vmul.f32 -1.442695, %v2308_v38 }
0x127e   :  { %v2451_v62 = vpop.f32.mrf.mxu1  ;;  %v2527_v63 = vpop.f32.mrf.mxu0 }
0x127f   :  { %v2456_v2 = vrot.slane %v2451_v62, 4  ;;  %v2532_v5 = vrot.slane %v2527_v63, 4 }
0x1280   :  { %v3976_v3 = vpop.f32.mrf.mxu1  ;;  %v3987_v4 = vpop.f32.mrf.mxu0 }
0x1281   :  { %2457 = vrot.lane.b32.xlu1 %v2456_v2, %s4423_s27 }
0x1285   :  { %2381 = vrot.lane.b32.xlu1 %v2380_v20, %s4425_s19 }
0x1289   :  { %2533 = vrot.lane.b32.xlu1 %v2532_v5, %s4424_s18 }
0x12f3   :  { %v2458_v0 = vpop.permute.xlu1 %2457 }
0x12f4   :  { %v2460_v6 = vadd.f32 %v2458_v0, %v4735_v44 }
0x12f6   :  { %4200 = vtanh.f32 %v2460_v6 }
0x12f7   :  { %4202 = vpow2.f32 %v3484_v40  ;;  %v2382_v7 = vpop.permute.xlu1 %2381 }
0x12f8   :  { %v2384_v8 = vadd.f32 %v2382_v7, %v4735_v44 }
0x12fa   :  { %v3483_v9 = vmul.f32 -1.442695, %v2384_v8 }
0x12fb   :  { %v2534_v25 = vpop.permute.xlu1 %2533 }
0x12fc   :  { %v2536_v26 = vadd.f32 %v2534_v25, %v4735_v44  ;;  %v5100_v44 = vld [vmem:[#allocation11 + $0x18] sm:$0xff] }
0x12fe   :  { %v3485_v28 = vmul.f32 -1.442695, %v2536_v26 }
0x1303   :  { %v4201_v35 = vpop.eup %4200 }
0x1304   :  { %2555 = vrot.lane.b32.xlu0 %v4201_v35, %s4423_s27  ;;  %v4203_v41 = vpop.eup %4202 }
0x1305   :  { %v2550_v42 = vadd.f32 1.0, %v4203_v41 }
0x1307   :  { %4204 = vrcp.f32 %v2550_v42 }
0x1308   :  { %4206 = vpow2.f32 %v3483_v9 }
0x1314   :  { %v4205_v39 = vpop.eup %4204 }
0x1315   :  { %v4207_v10 = vpop.eup %4206 }
0x1316   :  { %v2540_v11 = vadd.f32 1.0, %v4207_v10 }
0x1318   :  { %4208 = vrcp.f32 %v2540_v11 }
0x1325   :  { %v4209_v30 = vpop.eup %4208 }
0x1326   :  { %v2546_v13 = vmul.f32 %v4209_v30, %v2544_v12 }
0x1376   :  { %v2556_v43 = vpop.permute.xlu0 %2555 }
0x1377   :  { %v2558_v27 = vmul.f32 %v4205_v39, %v2556_v43 }
0x1379   :  { %2560 = vrot.lane.b32.xlu0 %v2558_v27, %s4425_s19 }
0x13eb   :  { %v2561_v15 = vpop.permute.xlu0 %2560 }
0x13ec   :  { %v5088_v17 = vadd.f32 %v2561_v15, %v2546_v13 }
0x13ee   :  { %4210 = vtanh.f32 %v5088_v17  ;;  %v2889_v39 = vrot.slane %v5088_v17, 4 }
0x13ef   :  { %4212 = vpow2.f32 %v3485_v28 }
0x13fb   :  { %v4211_v18 = vpop.eup %4210 }
0x13fc   :  { %2572 = vrot.lane.b32.xlu0 %v4211_v18, %s4423_s27  ;;  %v4213_v29 = vpop.eup %4212 }
0x13fd   :  { %v2567_v31 = vadd.f32 1.0, %v4213_v29 }
0x13ff   :  { %4214 = vrcp.f32 %v2567_v31 }
0x140c   :  { %v4215_v33 = vpop.eup %4214 }
0x146e   :  { %v2573_v34 = vpop.permute.xlu0 %2572 }
0x146f   :  { %v5093_v45 = vmul.f32 %v4215_v33, %v2573_v34 }
0x1471   :  { %v2581_v46 = vrot.slane %v5093_v45, 4 }
0x1473   :  { %2582 = vrot.lane.b32.xlu1 %v2581_v46, %s4425_s19 }
0x14e5   :  { %v2583_v47 = vpop.permute.xlu1 %2582 }
0x14e6   :  { %3997 = vmatmul.mubr.msk.f32.vlgmr.msra.gmra.mxu1 %vm391_vm4, %v2583_v47  ;;  %4008 = vmatmul.mubr.msk.f32.vlgmr.msra.gmra.mxu0 %vm391_vm4, %v2583_v47 }
0x14e7   :  { %4011 = vmatpush3.msra.mxu1 %v5000_v56  ;;  %4022 = vmatpush3.msra.mxu0 %v5100_v44 }
0x14e8   :  { %4012 = vmatprep.subr.mxu1 %v4421_v36  ;;  %4023 = vmatprep.subr.mxu0 %v4421_v36 }
0x14e9   :  { %4013 = vmatpush3.msra.mxu1 %v5009_v57  ;;  %4024 = vmatpush3.msra.mxu0 %v5106_v48 }
0x14ea   :  { %4014 = vmatprep.subr.mxu1 %v4421_v36  ;;  %4025 = vmatprep.subr.mxu0 %v4421_v36 }
0x14eb   :  { %4015 = vmatpush3.msra.mxu1 %v5018_v21  ;;  %4026 = vmatpush3.msra.mxu0 %v5112_v49 }
0x14ec   :  { %4016 = vmatprep.subr.mxu1 %v4421_v36  ;;  %4027 = vmatprep.subr.mxu0 %v4421_v36 }
0x14ed   :  { %4017 = vmatpush3.msra.mxu1 %v5027_v22  ;;  %4018 = vmatprep.mubr.msk.f32.mxu1 %vm4422_vm3, %v4421_v36 }
0x14ee   :  { %4028 = vmatpush3.msra.mxu0 %v5120_v50  ;;  %4029 = vmatprep.mubr.msk.f32.mxu0 %vm4422_vm3, %v4421_v36 }
0x14ef   :  { %4019 = vmatmul.mubr.msk.f32.vlgmr.msra.gmra.mxu1 %vm391_vm4, %v2583_v47  ;;  %4030 = vmatmul.mubr.msk.f32.vlgmr.msra.gmra.mxu0 %vm391_vm4, %v2583_v47 }
0x14f0   :  { %4032 = vmatprep.subr.mxu1 %v4421_v36  ;;  %4043 = vmatprep.subr.mxu0 %v4421_v36 }
0x14f1   :  { %4033 = vmatpush3.msra.mxu1 %v5042_v23  ;;  %4044 = vmatpush3.msra.mxu0 %v4260_v51 }
0x14f2   :  { %4034 = vmatprep.subr.mxu1 %v4421_v36  ;;  %4045 = vmatprep.subr.mxu0 %v4421_v36 }
0x14f3   :  { %4035 = vmatpush3.msra.mxu1 %v5051_v24  ;;  %4046 = vmatpush3.msra.mxu0 %v4261_v52 }
0x14f4   :  { %4036 = vmatprep.subr.mxu1 %v4421_v36  ;;  %4047 = vmatprep.subr.mxu0 %v4421_v36 }
0x14f5   :  { %4037 = vmatpush3.msra.mxu1 %v5060_v14  ;;  %4048 = vmatpush3.msra.mxu0 %v4262_v53 }
0x14f6   :  { %4038 = vmatprep.subr.mxu1 %v4421_v36  ;;  %4049 = vmatprep.subr.mxu0 %v4421_v36 }
0x14f7   :  { %4039 = vmatpush3.msra.mxu1 %v5069_v16  ;;  %4050 = vmatpush3.msra.mxu0 %v4263_v54 }
0x14f8   :  { %4040 = vmatprep.mubr.msk.f32.mxu1 %vm4422_vm3, %v4421_v36  ;;  %4051 = vmatprep.mubr.msk.f32.mxu0 %vm4422_vm3, %v4421_v36 }
0x14f9   :  { %4054 = vmatprep.subr.mxu1 %v4421_v36  ;;  %4065 = vmatprep.subr.mxu0 %v4421_v36 }
0x15a6   :  { %v2652_v55 = vpop.f32.mrf.mxu1  ;;  %v2723_v23 = vpop.f32.mrf.mxu0 }
0x15a7   :  { %v2656_v2 = vadd.f32 %v2652_v55, %v4732_v32 }
0x15a8   :  { %v3998_v24 = vpop.f32.mrf.mxu1  ;;  %v4009_v14 = vpop.f32.mrf.mxu0 }
0x15a9   :  { %v3491_v3 = vmul.f32 -1.442695, %v2656_v2 }
0x15af   :  { %v2798_v16 = vpop.f32.mrf.mxu1  ;;  %v2873_v19 = vpop.f32.mrf.mxu0 }
0x15b0   :  { %2803 = vrot.lane.b32.xlu0 %v2798_v16, %s4423_s27 }
0x15b1   :  { %v4020_v58 = vpop.f32.mrf.mxu1  ;;  %v4031_v60 = vpop.f32.mrf.mxu0 }
0x15b4   :  { %2728 = vrot.lane.b32.xlu0 %v2723_v23, %s4425_s19 }
0x15b8   :  { %2878 = vrot.lane.b32.xlu0 %v2873_v19, %s4424_s18 }
0x1622   :  { %v2804_v61 = vpop.permute.xlu0 %2803 }
0x1623   :  { %v2806_v62 = vadd.f32 %v2804_v61, %v4732_v32 }
0x1625   :  { %4216 = vtanh.f32 %v2806_v62 }
0x1626   :  { %4218 = vpow2.f32 %v3491_v3  ;;  %v2729_v35 = vpop.permute.xlu0 %2728  ;;  %v3281_v3 = vld [vmem:[%s5268_s11 + $0x18] sm:$0xff] }
0x1627   :  { %v2731_v37 = vadd.f32 %v2729_v35, %v4732_v32 }
0x1629   :  { %v3490_v38 = vmul.f32 -1.442695, %v2731_v37 }
0x162a   :  { %v2879_v9 = vpop.permute.xlu0 %2878 }
0x162b   :  { %v2881_v10 = vadd.f32 %v2879_v9, %v4732_v32 }
0x162d   :  { %v3492_v11 = vmul.f32 -1.442695, %v2881_v10 }
0x1632   :  { %v4217_v63 = vpop.eup %4216 }
0x1633   :  { %2900 = vrot.lane.b32.xlu1 %v4217_v63, %s4423_s27  ;;  %v4219_v4 = vpop.eup %4218 }
0x1634   :  { %v2895_v20 = vadd.f32 1.0, %v4219_v4  ;;  %v3280_v4 = vld [vmem:[%s5268_s11 + $0x10] sm:$0xff] }
0x1636   :  { %4220 = vrcp.f32 %v2895_v20  ;;  %v3279_v20 = vld [vmem:[%s5268_s11 + $0x8] sm:$0xff] }
0x1637   :  { %4222 = vpow2.f32 %v3490_v38 }
0x1643   :  { %v4221_v5 = vpop.eup %4220 }
0x1644   :  { %v4223_v40 = vpop.eup %4222 }
0x1645   :  { %v2885_v41 = vadd.f32 1.0, %v4223_v40 }
0x1647   :  { %4224 = vrcp.f32 %v2885_v41 }
0x1654   :  { %v4225_v42 = vpop.eup %4224 }
0x1655   :  { %v2891_v43 = vmul.f32 %v4225_v42, %v2889_v39 }
0x16a5   :  { %v2901_v0 = vpop.permute.xlu1 %2900 }
0x16a6   :  { %v2903_v6 = vmul.f32 %v4221_v5, %v2901_v0  ;;  %v3278_v5 = vld [vmem:[%s5268_s11] sm:$0xff]  ;;  %s4426_s11 = smov [#allocation12]  }
0x16a8   :  { %2905 = vrot.lane.b32.xlu1 %v2903_v6, %s4425_s19 }
0x171a   :  { %v2906_v27 = vpop.permute.xlu1 %2905 }
0x171b   :  { %v5166_v7 = vadd.f32 %v2906_v27, %v2891_v43 }
0x171d   :  { %4226 = vtanh.f32 %v5166_v7  ;;  %v3237_v54 = vrot.slane %v5166_v7, 4 }
0x171e   :  { %4228 = vpow2.f32 %v3492_v11 }
0x172a   :  { %v4227_v8 = vpop.eup %4226 }
0x172b   :  { %2917 = vrot.lane.b32.xlu1 %v4227_v8, %s4423_s27  ;;  %v4229_v30 = vpop.eup %4228 }
0x172c   :  { %v2912_v12 = vadd.f32 1.0, %v4229_v30 }
0x172e   :  { %4230 = vrcp.f32 %v2912_v12 }
0x173b   :  { %v4231_v13 = vpop.eup %4230 }
0x179d   :  { %v2918_v15 = vpop.permute.xlu1 %2917 }
0x179e   :  { %v2920_v17 = vmul.f32 %v4231_v13, %v2918_v15 }
0x17a0   :  { %2922 = vrot.lane.b32.xlu0 %v2920_v17, %s4425_s19 }
0x1812   :  { %v2923_v18 = vpop.permute.xlu0 %2922 }
0x1813   :  { %2925 = vst.msk [vmem:[#allocation2 + $0x18] sm:$0xf] %vm844_vm5, %v2923_v18  ;;  %4041 = vmatmul.mubr.msk.f32.vlgmr.msra.gmra.mxu1 %vm391_vm4, %v2923_v18  ;;  %4052 = vmatmul.mubr.msk.f32.vlgmr.msra.gmra.mxu0 %vm391_vm4, %v2923_v18 }
0x1814   :  { %4055 = vmatpush3.msra.mxu1 %v5000_v56  ;;  %4066 = vmatpush3.msra.mxu0 %v5100_v44 }
0x1815   :  { %4056 = vmatprep.subr.mxu1 %v4421_v36  ;;  %4067 = vmatprep.subr.mxu0 %v4421_v36 }
0x1816   :  { %4057 = vmatpush3.msra.mxu1 %v5009_v57  ;;  %4068 = vmatpush3.msra.mxu0 %v5106_v48 }
0x1817   :  { %4058 = vmatprep.subr.mxu1 %v4421_v36  ;;  %4069 = vmatprep.subr.mxu0 %v4421_v36 }
0x1818   :  { %4059 = vmatpush3.msra.mxu1 %v5018_v21  ;;  %4070 = vmatpush3.msra.mxu0 %v5112_v49 }
0x1819   :  { %4060 = vmatprep.subr.mxu1 %v4421_v36  ;;  %4071 = vmatprep.subr.mxu0 %v4421_v36 }
0x181a   :  { %4061 = vmatpush3.msra.mxu1 %v5027_v22  ;;  %4062 = vmatprep.mubr.msk.f32.mxu1 %vm4422_vm3, %v4421_v36 }
0x181b   :  { %4072 = vmatpush3.msra.mxu0 %v5120_v50  ;;  %4073 = vmatprep.mubr.msk.f32.mxu0 %vm4422_vm3, %v4421_v36 }
0x181c   :  { %4063 = vmatmul.mubr.msk.f32.vlgmr.msra.gmra.mxu1 %vm391_vm4, %v2923_v18  ;;  %4074 = vmatmul.mubr.msk.f32.vlgmr.msra.gmra.mxu0 %vm391_vm4, %v2923_v18 }
0x181d   :  { %4076 = vmatprep.subr.mxu1 %v3281_v3 }
0x181e   :  { %4077 = vmatpush3.msra.mxu1 %v3281_v3 }
0x181f   :  { %4078 = vmatprep.subr.mxu1 %v3280_v4 }
0x1820   :  { %4079 = vmatpush3.msra.mxu1 %v3280_v4 }
0x1821   :  { %4080 = vmatprep.subr.mxu1 %v3279_v20 }
0x1822   :  { %4081 = vmatpush3.msra.mxu1 %v3279_v20 }
0x1823   :  { %4082 = vmatprep.subr.mxu1 %v3278_v5 }
0x1824   :  { %4083 = vmatpush3.msra.mxu1 %v3278_v5 }
0x18d3   :  { %v2994_v56 = vpop.f32.mrf.mxu1  ;;  %v3068_v57 = vpop.f32.mrf.mxu0 }
0x18d4   :  { %v3073_v33 = vrot.slane %v3068_v57, 4  ;;  %v2999_v24 = vrot.slane %v2994_v56, 4 }
0x18d5   :  { %v4042_v21 = vpop.f32.mrf.mxu1  ;;  %v4053_v25 = vpop.f32.mrf.mxu0 }
0x18d6   :  { %v3001_v14 = vadd.f32 %v2999_v24, %v4732_v32 }
0x18d8   :  { %v3498_v16 = vmul.f32 -1.442695, %v3001_v14 }
0x18dc   :  { %v3144_v26 = vpop.f32.mrf.mxu1  ;;  %v3220_v28 = vpop.f32.mrf.mxu0 }
0x18dd   :  { %v3149_v29 = vrot.slane %v3144_v26, 4  ;;  %v3225_v34 = vrot.slane %v3220_v28, 4 }
0x18de   :  { %v4064_v22 = vpop.f32.mrf.mxu1  ;;  %v4075_v31 = vpop.f32.mrf.mxu0 }
0x18df   :  { %3150 = vrot.lane.b32.xlu1 %v3149_v29, %s4423_s27 }
0x18e3   :  { %3074 = vrot.lane.b32.xlu1 %v3073_v33, %s4425_s19 }
0x18e7   :  { %3226 = vrot.lane.b32.xlu1 %v3225_v34, %s4424_s18 }
0x18eb   :  { %1190 = vrot.lane.b32.xlu1 %v4809_v1, %s4425_s19 }
0x18ef   :  { %2577 = vrot.lane.b32.xlu1 %v5093_v45, %s4425_s19 }
0x1951   :  { %v3151_v36 = vpop.permute.xlu1 %3150 }
0x1952   :  { %v3153_v46 = vadd.f32 %v3151_v36, %v4732_v32 }
0x1954   :  { %4232 = vtanh.f32 %v3153_v46 }
0x1955   :  { %v3075_v47 = vpop.permute.xlu1 %3074 }
0x1956   :  { %v3077_v44 = vadd.f32 %v3075_v47, %v4732_v32 }
0x1958   :  { %v3497_v48 = vmul.f32 -1.442695, %v3077_v44 }
0x1959   :  { %v3227_v49 = vpop.permute.xlu1 %3226 }
0x195a   :  { %4234 = vpow2.f32 %v3497_v48  ;;  %v3229_v6 = vadd.f32 %v3227_v49, %v4732_v32 }
0x195c   :  { %v3499_v35 = vmul.f32 -1.442695, %v3229_v6 }
0x195d   :  { %v1191_v50 = vpop.permute.xlu1 %1190 }
0x195e   :  { %1194 = vst.msk [vmem:[#allocation2] sm:$0xf0] %vm1193_vm6, %v1191_v50 }
0x1961   :  { %v4233_v51 = vpop.eup %4232  ;;  %v2578_v52 = vpop.permute.xlu1 %2577 }
0x1962   :  { %2580 = vst.msk [vmem:[#allocation2 + $0x10] sm:$0xf0] %vm1193_vm6, %v2578_v52  ;;  %3248 = vrot.lane.b32.xlu0 %v4233_v51, %s4423_s27 }
0x1965   :  { %v3274_v1 = vld [vmem:[#allocation2] sm:$0xff] }
0x1966   :  { %4084 = vmatprep.mubr.msk.f32.mxu1 %vm391_vm4, %v3274_v1 }
0x1967   :  { %v4235_v45 = vpop.eup %4234 }
0x1968   :  { %v3233_v53 = vadd.f32 1.0, %v4235_v45 }
0x1969   :  { %v3276_v32 = vld [vmem:[#allocation2 + $0x10] sm:$0xff] }
0x196a   :  { %4236 = vrcp.f32 %v3233_v53 }
0x196b   :  { %4238 = vpow2.f32 %v3498_v16 }
0x1977   :  { %v4237_v55 = vpop.eup %4236 }
0x1978   :  { %v3239_v23 = vmul.f32 %v4237_v55, %v3237_v54  ;;  %v4239_v19 = vpop.eup %4238 }
0x1979   :  { %v3243_v58 = vadd.f32 1.0, %v4239_v19 }
0x197b   :  { %4240 = vrcp.f32 %v3243_v58 }
0x1988   :  { %v4241_v60 = vpop.eup %4240 }
0x19d4   :  { %v3249_v61 = vpop.permute.xlu0 %3248 }
0x19d5   :  { %v3251_v62 = vmul.f32 %v4241_v60, %v3249_v61 }
0x19d7   :  { %3253 = vrot.lane.b32.xlu0 %v3251_v62, %s4425_s19 }
0x1a49   :  { %v3254_v63 = vpop.permute.xlu0 %3253 }
0x1a4a   :  { %v3256_v2 = vadd.f32 %v3254_v63, %v3239_v23 }
0x1a4c   :  { %4242 = vtanh.f32 %v3256_v2  ;;  %3393 = vrot.lane.b32.xlu1 %v3256_v2, %s4424_s18  ;;  %s4427_s18 = smov [#allocation13]  }
0x1a4d   :  { %4244 = vpow2.f32 %v3499_v35 }
0x1a59   :  { %v4243_v0 = vpop.eup %4242 }
0x1a5a   :  { %3265 = vrot.lane.b32.xlu0 %v4243_v0, %s4423_s27  ;;  %v4245_v37 = vpop.eup %4244  ;;  %s3405_s27 = sshll.u32 %s4426_s11, 4  ;;  %s3406_s27 = int_to_ptr.vmem [resolvable:$true] %s3405_s27 }
0x1a5b   :  { %v3260_v38 = vadd.f32 1.0, %v4245_v37  ;;  %s4364_s23 = scalar_lea.vmem %s3406_s27, 64  ;;  %p4369_p12 = scmp.lt.s32.totalorder %s3406_s27, %s3406_s27 }
0x1a5c   :  { %p4365_p11 = scmp.ne.s32.totalorder %s3406_s27, %s4364_s23  ;;  %p4370_p13 = scmp.lt.s32.totalorder %s4364_s23, %s4364_s23 }
0x1a5d   :  { %4246 = vrcp.f32 %v3260_v38 }
0x1a5e   :  { %1884 = vrot.lane.b32.xlu0 %v4931_v59, %s4425_s19  ;;  %p4371_p0 = por %p4370_p13, %p4369_p12 }
0x1a60   :  { %p4372_p1 = pnand %p4371_p0, %p4365_p11 }
0x1a6a   :  { %v4247_v41 = vpop.eup %4246 }
0x1abe   :  { %v3394_v40 = vpop.permute.xlu1 %3393 }
0x1abf   :  { %3396 = vst.msk [vmem:[#allocation13 - $0x4] sm:$0xf0] %vm1193_vm6, %v3394_v40 }
0x1acc   :  { %v3266_v42 = vpop.permute.xlu0 %3265 }
0x1acd   :  { %v3268_v39 = vmul.f32 %v4247_v41, %v3266_v42 }
0x1acf   :  { %3270 = vrot.lane.b32.xlu0 %v3268_v39, %s4425_s19  ;;  %s3415_s19 = sshll.u32 %s4427_s18, 4  ;;  %s3416_s19 = int_to_ptr.vmem [resolvable:$true] %s3415_s19 }
0x1ad0   :  { %v1885_v43 = vpop.permute.xlu0 %1884 }
0x1ad1   :  { %1887 = vst.msk [vmem:[#allocation2 + $0x8] sm:$0xf0] %vm1193_vm6, %v1885_v43 }
0x1ad8   :  { %v3275_v27 = vld [vmem:[#allocation2 + $0x8] sm:$0xff] }
0x1ad9   :  { %4085 = vmatmul.mubr.msk.f32.vlgmr.msra.gmra.mxu1 %vm391_vm4, %v3275_v27 }
0x1ada   :  { %4087 = vmatprep.mubr.msk.f32.mxu1 %vm391_vm4, %v3276_v32 }
0x1b41   :  { %v3271_v59 = vpop.permute.xlu0 %3270 }
0x1b42   :  { %3273 = vst.msk [vmem:[#allocation2 + $0x18] sm:$0xf0] %vm1193_vm6, %v3271_v59  ;;  %3391 = vst.msk [vmem:[#allocation12 - $0x4] sm:$0xf0] %vm1193_vm6, %v3271_v59 }
0x1b49   :  { %v3277_v7 = vld [vmem:[#allocation2 + $0x18] sm:$0xff] }
0x1b4a   :  { %4088 = vmatmul.mubr.msk.f32.gmra.mxu1 %vm391_vm4, %v3277_v7 }
0x1b4b   :  { %4375 = shalt.err (!%p4372_p1)
}
0x1b4c   :  { %3408 = dma.vmem_to_hbm [thread:$0]  %s3406_s27, 64, %s5271_s14, [#allocation5]  }
0x1b4d   :  { %s4384_s26 = scalar_lea.vmem %s3416_s19, 64  ;;  %p4389_p3 = scmp.lt.s32.totalorder %s3416_s19, %s3416_s19 }
0x1b4e   :  { %p4385_p2 = scmp.ne.s32.totalorder %s3416_s19, %s4384_s26  ;;  %p4390_p4 = scmp.lt.s32.totalorder %s4384_s26, %s4384_s26 }
0x1b50   :  { %p4391_p5 = por %p4390_p4, %p4389_p3 }
0x1b52   :  { %p4392_p6 = pnand %p4391_p5, %p4385_p2 }
0x1b54   :  { %4395 = shalt.err (!%p4392_p6)
}
0x1b55   :  { %3418 = dma.vmem_to_hbm [thread:$0]  %s3416_s19, 64, %s5272_s15, [#allocation14]   ;;  %v3500_v8 = vld [vmem:[%s5269_s12] ss:$0 sm:$0xff]  ;;  %vm3386_vm7 = vcmask 64512  }
0x1b99   :  { %v4086_v9 = vpop.f32.mrf.mxu1 }
0x1b9a   :  { %v3373_v10 = vadd.f32 %v4086_v9, %v3500_v8 }
0x1b9b   :  { %v3367_v11 = vpop.f32.mrf.mxu1 }
0x1b9c   :  { %3388 = vst.msk [vmem:[%s5270_s13 + $0x8] sm:$0xff] %vm3386_vm7, %v3373_v10  ;;  %v3368_v30 = vadd.f32 %v3500_v8, %v3367_v11 }
0x1b9e   :  { %3387 = vst.msk [vmem:[%s5270_s13] sm:$0xff] %vm3386_vm7, %v3368_v30 }
0x1c0a   :  { %v4089_v12 = vpop.f32.mrf.mxu1 }
0x1c0b   :  { %v3383_v13 = vadd.f32 %v4089_v12, %v3500_v8 }
0x1c0c   :  { %v3377_v15 = vpop.f32.mrf.mxu1 }
0x1c0d   :  { %3390 = vst.msk [vmem:[%s5270_s13 + $0x18] sm:$0xff] %vm3386_vm7, %v3383_v13  ;;  %v3378_v17 = vadd.f32 %v3500_v8, %v3377_v15 }
0x1c0f   :  { %3389 = vst.msk [vmem:[%s5270_s13 + $0x10] sm:$0xff] %vm3386_vm7, %v3378_v17 }
0x1c10   :  { %4410 = dma.done.wait [#allocation5], 64  }
0x1c11   :  { %4411 = vsyncadd [#allocation5], 4294967232 }
0x1c12   :  { %4412 = dma.done.wait [#allocation14], 64  }
0x1c13   :  { %4413 = vsyncadd [#allocation14], 4294967232 }
0x1c14   :  { %3427 = vsyncpa [#allocation4], 1 }
0x1c15   :  { %3428 = vsyncpa [#allocation7], 1 }
0x1c16   :  { %3429 = vsyncpa [#allocation10], 1 }
0x1c17   :  { %3430 = vsyncpa [#allocation5], 1 }
0x1c18   :  { %3431 = vsyncpa [#allocation14], 1 }

</bundles_post_ra>
